<compile_context>
chip_gen: v7x
topology: tpu7x:2x2x1
jax: 0.10.0
libtpu: 0.0.40
codegen_flags: <defaults>
</compile_context>

<pallas_src>
import math
from functools import partial

import numpy as np
import jax
import jax.numpy as jnp
from jax.experimental import pallas as pl
from jax.experimental.pallas import tpu as pltpu

EPS = 1e-6
MASK_NEG = -1e9


# ----------------------------------------------------------------------------
# Kernel-side math helpers
# ----------------------------------------------------------------------------
def _ln(x, a, b, eps=EPS):
    # Annotated-Transformer custom LayerNorm: mean, *unbiased* std (n-1
    # divisor), eps added to std.  Exact division for parity with torch.
    mean = jnp.mean(x, axis=-1, keepdims=True)
    diff = x - mean
    var = jnp.sum(diff * diff, axis=-1, keepdims=True) * (1.0 / (x.shape[-1] - 1))
    return a * diff / (jnp.sqrt(var) + eps) + b


def _split_heads(x2d, n_heads):
    # One relayout per tensor (reshape + transpose) instead of n_heads lane
    # slices + stack.
    s, d = x2d.shape
    return jnp.swapaxes(x2d.reshape(s, n_heads, d // n_heads), 0, 1)  # (H,S,dh)


def _merge_heads(xh):
    h, s, dh = xh.shape
    return jnp.swapaxes(xh, 0, 1).reshape(s, h * dh)                  # (S,D)


def _heads_attention(q, k, v, addmask, n_heads):
    """Batched-head attention on (S, D) projections.

    q is pre-scaled (1/sqrt(d_head) folded into the Q projection weights).
    addmask is an additive f32 mask broadcastable to (S_q, S_k).
    Matmul operands are bf16; softmax/accumulation stay f32.
    """
    qh = _split_heads(q, n_heads).astype(jnp.bfloat16)
    kh = _split_heads(k, n_heads).astype(jnp.bfloat16)
    vh = _split_heads(v, n_heads).astype(jnp.bfloat16)
    s = jnp.einsum('hqd,hkd->hqk', qh, kh, preferred_element_type=jnp.float32)
    s = s + addmask[None]
    m = jnp.max(s, axis=-1, keepdims=True)
    e = jnp.exp(s - m)
    p = e * pl.reciprocal(jnp.sum(e, axis=-1, keepdims=True), approx=True)
    oh = jnp.einsum('hqk,hkd->hqd', p.astype(jnp.bfloat16), vh,
                    preferred_element_type=jnp.float32)
    return _merge_heads(oh)


# ----------------------------------------------------------------------------
# Fused decoder kernel: one (batch, layer) grid step = one decoder layer
# ----------------------------------------------------------------------------
def decoder_layer_kernel(x_ref, mem_ref, smask_ref, tmask_ref,
                         wsqkv_ref, bsqkv_ref, wckv_ref, bckv_ref,
                         wdd_ref, bdd_ref, w1_ref, b1_ref, w2_ref, b2_ref,
                         lna_ref, lnb_ref, fna_ref, fnb_ref,
                         o_ref, x_sc, *, n_heads):
    layer = pl.program_id(1)
    D = x_ref.shape[-1]

    # Activation becomes resident in VMEM scratch across the layer axis.
    @pl.when(layer == 0)
    def _():
        x_sc[...] = x_ref[0].astype(jnp.float32)

    x = x_sc[...]                                   # (S, D) f32
    mem = mem_ref[0].astype(jnp.bfloat16)           # (Sm, D) matmul operand

    # Additive masks (f32, cheap elementwise; tiny vs. attention matmuls).
    t_addmask = jnp.where(tmask_ref[0] == 0.0,
                          jnp.float32(MASK_NEG), jnp.float32(0.0))  # (S, S)
    s_addmask = jnp.where(smask_ref[0] == 0.0,
                          jnp.float32(MASK_NEG), jnp.float32(0.0))  # (1, Sm)

    lna = lna_ref[0]            # (3, D)
    lnb = lnb_ref[0]            # (3, D)
    bdd = bdd_ref[0]            # (3, D) [self-out, cross-q, cross-out] biases

    # --- sublayer 0: pre-LN masked self-attention + residual ----------------
    xn = _ln(x, lna[0:1], lnb[0:1])
    qkv = jnp.dot(xn.astype(jnp.bfloat16), wsqkv_ref[0],
                  preferred_element_type=jnp.float32) + bsqkv_ref[0]
    a = _heads_attention(qkv[:, :D], qkv[:, D:2 * D], qkv[:, 2 * D:],
                         t_addmask, n_heads)
    x = x + jnp.dot(a.astype(jnp.bfloat16), wdd_ref[0, 0],
                    preferred_element_type=jnp.float32) + bdd[0:1]

    # --- sublayer 1: pre-LN cross-attention over encoder memory -------------
    xn = _ln(x, lna[1:2], lnb[1:2])
    q = jnp.dot(xn.astype(jnp.bfloat16), wdd_ref[0, 1],
                preferred_element_type=jnp.float32) + bdd[1:2]
    kv = jnp.dot(mem, wckv_ref[0],
                 preferred_element_type=jnp.float32) + bckv_ref[0]
    a = _heads_attention(q, kv[:, :D], kv[:, D:], s_addmask, n_heads)
    x = x + jnp.dot(a.astype(jnp.bfloat16), wdd_ref[0, 2],
                    preferred_element_type=jnp.float32) + bdd[2:3]

    # --- sublayer 2: pre-LN position-wise FFN + residual ---------------------
    xn = _ln(x, lna[2:3], lnb[2:3])
    h = jnp.maximum(
        jnp.dot(xn.astype(jnp.bfloat16), w1_ref[0],
                preferred_element_type=jnp.float32) + b1_ref[0], 0.0)
    x = x + jnp.dot(h.astype(jnp.bfloat16), w2_ref[0],
                    preferred_element_type=jnp.float32) + b2_ref[0]

    x_sc[...] = x

    # Final decoder LayerNorm, written once per batch element.
    @pl.when(layer == pl.num_programs(1) - 1)
    def _():
        o_ref[0] = _ln(x, fna_ref[...], fnb_ref[...]).astype(o_ref.dtype)


# ----------------------------------------------------------------------------
# Parameter packing: per-layer layout -> stacked, fused-kernel layout (bf16 W)
# ----------------------------------------------------------------------------
def pack_layer_params(layer_params, n_heads, matmul_dtype=jnp.bfloat16):
    """layer_params: list of (aw(8,D,D), ab(8,D), w1, b1, w2, b2, lna, lnb).

    aw/ab index: 0..3 = self-attn q,k,v,o ; 4..7 = cross-attn q,k,v,o.
    Packs QKV into one (D,3D) matmul, cross K/V into (D,2D), folds the
    1/sqrt(d_head) scale into the Q projections, stacks over layers, and
    stores matmul weights as bf16 (biases / LN params stay f32).
    """
    D = layer_params[0][0].shape[-1]
    scale = 1.0 / math.sqrt(D // n_heads)
    wsqkv, bsqkv, wckv, bckv, wdd, bdd = [], [], [], [], [], []
    w1s, b1s, w2s, b2s, lnas, lnbs = [], [], [], [], [], []
    for (aw, ab, w1, b1, w2, b2, lna, lnb) in layer_params:
        wq_s, bq_s = aw[0] * scale, ab[0] * scale          # fold score scale
        wq_c, bq_c = aw[4] * scale, ab[4] * scale
        wsqkv.append(jnp.concatenate([wq_s, aw[1], aw[2]], axis=1))   # (D,3D)
        bsqkv.append(jnp.concatenate([bq_s, ab[1], ab[2]])[None, :])  # (1,3D)
        wckv.append(jnp.concatenate([aw[5], aw[6]], axis=1))          # (D,2D)
        bckv.append(jnp.concatenate([ab[5], ab[6]])[None, :])         # (1,2D)
        wdd.append(jnp.stack([aw[3], wq_c, aw[7]]))                   # (3,D,D)
        bdd.append(jnp.stack([ab[3], bq_c, ab[7]]))                   # (3,D)
        w1s.append(w1); b1s.append(b1); w2s.append(w2); b2s.append(b2)
        lnas.append(lna); lnbs.append(lnb)
    stf = lambda xs: jnp.stack(xs, axis=0)                            # f32
    stw = lambda xs: jnp.stack(xs, axis=0).astype(matmul_dtype)       # bf16
    return (stw(wsqkv), stf(bsqkv), stw(wckv), stf(bckv), stw(wdd), stf(bdd),
            stw(w1s), stf(b1s), stw(w2s), stf(b2s), stf(lnas), stf(lnbs))


# ----------------------------------------------------------------------------
# Wrapper: one pallas_call over grid (batch, layer)
# ----------------------------------------------------------------------------
def decoder_forward(x, memory, src_mask, tgt_mask, layer_params,
                    norm_a, norm_b, n_heads):
    B, S, D = x.shape
    Sm = memory.shape[1]
    N = len(layer_params)
    (wsqkv, bsqkv, wckv, bckv, wdd, bdd,
     w1, b1, w2, b2, lna, lnb) = pack_layer_params(layer_params, n_heads)
    DFF = w1.shape[-1]

    def per_batch(shape):
        zeros = (0,) * len(shape)
        return pl.BlockSpec((1,) + tuple(shape), lambda b, l: (b,) + zeros)

    def per_layer(shape):
        zeros = (0,) * len(shape)
        return pl.BlockSpec((1,) + tuple(shape), lambda b, l: (l,) + zeros)

    def const(shape):
        zeros = (0,) * len(shape)
        return pl.BlockSpec(tuple(shape), lambda b, l: zeros)

    # ---- explicit VMEM budget (weights double-buffered per layer + acts) ----
    bf16_b, f32_b = 2, 4
    w_layer = (D * 3 * D + D * 2 * D + 3 * D * D + 2 * D * DFF) * bf16_b
    b_layer = (3 * D + 2 * D + 3 * D + DFF + D + 6 * D) * f32_b
    act = (2 * S * D + Sm * D + S * S + Sm) * f32_b          # x, out, mem, masks
    scores = 2 * n_heads * (S * S + S * Sm) * f32_b          # per-head S + P
    interm = (S * 3 * D + Sm * 2 * D + S * DFF + 6 * S * D) * f32_b
    est = 2 * (w_layer + b_layer) + 2 * act + scores + interm + S * D * f32_b
    vmem_limit = int(min(max(4 * est, 32 * 1024 * 1024), 64 * 1024 * 1024))

    # ---- advisory cost estimate for the XLA scheduler ------------------------
    mm_flops_layer = 2 * (S * D * 3 * D + 3 * S * D * D + Sm * D * 2 * D
                          + 2 * S * S * D + 2 * S * Sm * D + 2 * S * D * DFF)
    flops = int(B * N * mm_flops_layer)
    transcendentals = int(B * N * n_heads * (S * S + S * Sm))
    weight_bytes = int(sum(int(a.size) * a.dtype.itemsize for a in
                           (wsqkv, bsqkv, wckv, bckv, wdd, bdd,
                            w1, b1, w2, b2, lna, lnb, norm_a, norm_b)))
    bytes_accessed = int((x.size + memory.size + src_mask.size
                          + tgt_mask.size + B * S * D) * 4 + B * weight_bytes)

    kernel = partial(decoder_layer_kernel, n_heads=n_heads)
    return pl.pallas_call(
        kernel,
        out_shape=jax.ShapeDtypeStruct((B, S, D), x.dtype),
        grid=(B, N),
        in_specs=[
            per_batch((S, D)),        # x (read only at l == 0)
            per_batch((Sm, D)),       # memory
            per_batch((1, Sm)),       # source_mask
            per_batch((S, S)),        # target_mask
            per_layer((D, 3 * D)),    # self-attn packed QKV weight (bf16)
            per_layer((1, 3 * D)),    # self-attn packed QKV bias
            per_layer((D, 2 * D)),    # cross-attn packed KV weight (bf16)
            per_layer((1, 2 * D)),    # cross-attn packed KV bias
            per_layer((3, D, D)),     # [self-out, cross-q, cross-out] W (bf16)
            per_layer((3, D)),        # [self-out, cross-q, cross-out] biases
            per_layer((D, DFF)),      # ffn w1 (bf16)
            per_layer((1, DFF)),      # ffn b1
            per_layer((DFF, D)),      # ffn w2 (bf16)
            per_layer((1, D)),        # ffn b2
            per_layer((3, D)),        # sublayer LN gamma
            per_layer((3, D)),        # sublayer LN beta
            const((1, D)),            # final LN gamma
            const((1, D)),            # final LN beta
        ],
        out_specs=per_batch((S, D)),
        scratch_shapes=[pltpu.VMEM((S, D), jnp.float32)],   # resident activation
        compiler_params=pltpu.CompilerParams(
            dimension_semantics=("parallel", "arbitrary"),
            vmem_limit_bytes=vmem_limit),
        cost_estimate=pl.CostEstimate(flops=flops,
                                      transcendentals=transcendentals,
                                      bytes_accessed=bytes_accessed),
    )(x, memory, src_mask, tgt_mask, wsqkv, bsqkv, wckv, bckv, wdd, bdd,
      w1, b1, w2, b2, lna, lnb, norm_a, norm_b)


# ----------------------------------------------------------------------------
# Pure-JAX reference (original per-head / f32 math) for verification
# ----------------------------------------------------------------------------
def _ref_layernorm(x, a, b, eps=EPS):
    mean = jnp.mean(x, axis=-1, keepdims=True)
    diff = x - mean
    var = jnp.sum(diff * diff, axis=-1, keepdims=True) / (x.shape[-1] - 1)
    return a * diff / (jnp.sqrt(var) + eps) + b


def _ref_mha(q_in, k_in, v_in, wq, bq, wk, bk, wv, bv, wo, bo, mask, n_heads):
    d = q_in.shape[-1]
    dh = d // n_heads
    scale = 1.0 / math.sqrt(dh)
    q = q_in @ wq + bq
    k = k_in @ wk + bk
    v = v_in @ wv + bv
    heads = []
    for h in range(n_heads):
        qh = q[:, h * dh:(h + 1) * dh]
        kh = k[:, h * dh:(h + 1) * dh]
        vh = v[:, h * dh:(h + 1) * dh]
        s = (qh @ kh.T) * scale
        s = jnp.where(mask == 0, -1e9, s)
        e = jnp.exp(s - jnp.max(s, axis=-1, keepdims=True))
        p = e / jnp.sum(e, axis=-1, keepdims=True)
        heads.append(p @ vh)
    return jnp.concatenate(heads, axis=-1) @ wo + bo


def ref_decoder(x, memory, src_mask, tgt_mask, layer_params, norm_a, norm_b,
                n_heads):
    B = x.shape[0]
    outs = []
    for bi in range(B):
        xb = x[bi].astype(jnp.float32)
        mb = memory[bi].astype(jnp.float32)
        sm = src_mask[bi]
        tm = tgt_mask[bi]
        for (aw, ab, w1, b1, w2, b2, lna, lnb) in layer_params:
            xn = _ref_layernorm(xb, lna[0], lnb[0])
            xb = xb + _ref_mha(xn, xn, xn, aw[0], ab[0], aw[1], ab[1],
                               aw[2], ab[2], aw[3], ab[3], tm, n_heads)
            xn = _ref_layernorm(xb, lna[1], lnb[1])
            xb = xb + _ref_mha(xn, mb, mb, aw[4], ab[4], aw[5], ab[5],
                               aw[6], ab[6], aw[7], ab[7], sm, n_heads)
            xn = _ref_layernorm(xb, lna[2], lnb[2])
            h = jnp.maximum(xn @ w1 + b1[0], 0.0)
            xb = xb + h @ w2 + b2[0]
        outs.append(_ref_layernorm(xb, norm_a[0], norm_b[0]))
    return jnp.stack(outs, 0)


# ----------------------------------------------------------------------------
# Deterministic parameter construction
# ----------------------------------------------------------------------------
def init_layer_params(key, D, DFF):
    ks = jax.random.split(key, 6)
    # Weights stored as (d_in, d_out), i.e. y = x @ W + b.
    aw = jax.random.normal(ks[0], (8, D, D), jnp.float32) * (1.0 / math.sqrt(D))
    ab = jax.random.normal(ks[1], (8, D), jnp.float32) * 0.02
    w1 = jax.random.normal(ks[2], (D, DFF), jnp.float32) * (1.0 / math.sqrt(D))
    b1 = jax.random.normal(ks[3], (1, DFF), jnp.float32) * 0.02
    w2 = jax.random.normal(ks[4], (DFF, D), jnp.float32) * (1.0 / math.sqrt(DFF))
    b2 = jax.random.normal(ks[5], (1, D), jnp.float32) * 0.02
    lna = jnp.ones((3, D), jnp.float32)    # LayerNorm a2 init (ones)
    lnb = jnp.zeros((3, D), jnp.float32)   # LayerNorm b2 init (zeros)
    return (aw, ab, w1, b1, w2, b2, lna, lnb)


if __name__ == "__main__":
    # NOTE: D=32 / dh=8 are toy shapes (lane/MXU under-utilization is a
    # shape artifact); production D>=128 (multiples of 256 on v6e/v7x) fills
    # the lanes and MXU.
    B, S, SM, D, DFF, HEADS, N = 2, 8, 8, 32, 64, 4, 2

    key = jax.random.PRNGKey(0)
    k_x, k_m, k_p = jax.random.split(key, 3)

    x = jax.random.normal(k_x, (B, S, D), jnp.float32)
    memory = jax.random.normal(k_m, (B, SM, D), jnp.float32)

    # target_mask: causal (subsequent) mask; source_mask: padding mask.
    tgt_mask = jnp.broadcast_to(jnp.tril(jnp.ones((S, S), jnp.float32)),
                                (B, S, S))
    src_mask = jnp.ones((B, 1, SM), jnp.float32)
    src_mask = src_mask.at[0, 0, SM - 2:].set(0.0)   # pad out last 2 mem slots

    layer_keys = jax.random.split(k_p, N)
    layer_params = [init_layer_params(layer_keys[i], D, DFF) for i in range(N)]
    norm_a = jnp.ones((1, D), jnp.float32)
    norm_b = jnp.zeros((1, D), jnp.float32)

    out = decoder_forward(x, memory, src_mask, tgt_mask, layer_params,
                          norm_a, norm_b, HEADS)
    out = jax.block_until_ready(out)

    ref = ref_decoder(x, memory, src_mask, tgt_mask, layer_params,
                      norm_a, norm_b, HEADS)
    ref = jax.block_until_ready(ref)

    assert out.shape == (B, S, D)
    # Tolerance accounts for bf16 matmul operands (f32 accumulation).
    assert np.allclose(np.asarray(out), np.asarray(ref), atol=5e-2, rtol=5e-2), \
        "Pallas decoder output diverges from reference"

    print("KERNEL_OK")
</pallas_src>

<mosaic_0001>
module attributes {stable_mosaic.version = 11 : i64} {
  func.func @decoder_layer_kernel(%arg0: i32, %arg1: i32, %arg2: memref<1x8x32xf32, #tpu.memory_space<vmem>>, %arg3: memref<1x8x32xf32, #tpu.memory_space<vmem>>, %arg4: memref<1x1x8xf32, #tpu.memory_space<vmem>>, %arg5: memref<1x8x8xf32, #tpu.memory_space<vmem>>, %arg6: memref<1x32x96xbf16, #tpu.memory_space<vmem>>, %arg7: memref<1x1x96xf32, #tpu.memory_space<vmem>>, %arg8: memref<1x32x64xbf16, #tpu.memory_space<vmem>>, %arg9: memref<1x1x64xf32, #tpu.memory_space<vmem>>, %arg10: memref<1x3x32x32xbf16, #tpu.memory_space<vmem>>, %arg11: memref<1x3x32xf32, #tpu.memory_space<vmem>>, %arg12: memref<1x32x64xbf16, #tpu.memory_space<vmem>>, %arg13: memref<1x1x64xf32, #tpu.memory_space<vmem>>, %arg14: memref<1x64x32xbf16, #tpu.memory_space<vmem>>, %arg15: memref<1x1x32xf32, #tpu.memory_space<vmem>>, %arg16: memref<1x3x32xf32, #tpu.memory_space<vmem>>, %arg17: memref<1x3x32xf32, #tpu.memory_space<vmem>>, %arg18: memref<1x32xf32, #tpu.memory_space<vmem>>, %arg19: memref<1x32xf32, #tpu.memory_space<vmem>>, %arg20: memref<1x8x32xf32, #tpu.memory_space<vmem>>, %arg21: memref<8x32xf32, #tpu.memory_space<vmem>>) attributes {dimension_semantics = [#tpu.dimension_semantics<parallel>, #tpu.dimension_semantics<arbitrary>], iteration_bounds = array<i64: 2, 2>, scalar_prefetch = 0 : i64, scratch_operands = 1 : i64, tpu.core_type = #tpu.core_type<tc>, window_params = [{transform_indices = @transform_0, window_bounds = array<i64: 1, 8, 32>}, {transform_indices = @transform_1, window_bounds = array<i64: 1, 8, 32>}, {transform_indices = @transform_2, window_bounds = array<i64: 1, 1, 8>}, {transform_indices = @transform_3, window_bounds = array<i64: 1, 8, 8>}, {transform_indices = @transform_4, window_bounds = array<i64: 1, 32, 96>}, {transform_indices = @transform_5, window_bounds = array<i64: 1, 1, 96>}, {transform_indices = @transform_6, window_bounds = array<i64: 1, 32, 64>}, {transform_indices = @transform_7, window_bounds = array<i64: 1, 1, 64>}, {transform_indices = @transform_8, window_bounds = array<i64: 1, 3, 32, 32>}, {transform_indices = @transform_9, window_bounds = array<i64: 1, 3, 32>}, {transform_indices = @transform_10, window_bounds = array<i64: 1, 32, 64>}, {transform_indices = @transform_11, window_bounds = array<i64: 1, 1, 64>}, {transform_indices = @transform_12, window_bounds = array<i64: 1, 64, 32>}, {transform_indices = @transform_13, window_bounds = array<i64: 1, 1, 32>}, {transform_indices = @transform_14, window_bounds = array<i64: 1, 3, 32>}, {transform_indices = @transform_15, window_bounds = array<i64: 1, 3, 32>}, {pipeline_mode = #tpu.pipeline_mode<synchronous>, transform_indices = @transform_16, window_bounds = array<i64: 1, 32>}, {pipeline_mode = #tpu.pipeline_mode<synchronous>, transform_indices = @transform_17, window_bounds = array<i64: 1, 32>}, {transform_indices = @transform_18, window_bounds = array<i64: 1, 8, 32>}]} {
    %c0_i32 = arith.constant 0 : i32
    %0 = arith.cmpi eq, %arg1, %c0_i32 : i32
    %1 = arith.extui %0 : i1 to i32
    %c0_i32_0 = arith.constant 0 : i32
    %2 = arith.cmpi ne, %1, %c0_i32_0 : i32
    scf.if %2 {
      %c0_93 = arith.constant 0 : index
      %c0_94 = arith.constant 0 : index
      %c0_95 = arith.constant 0 : index
      %213 = vector.load %arg2[%c0_93, %c0_94, %c0_95] : memref<1x8x32xf32, #tpu.memory_space<vmem>>, vector<1x8x32xf32>
      %214 = vector.shape_cast %213 : vector<1x8x32xf32> to vector<8x32xf32>
      %c0_96 = arith.constant 0 : index
      %c0_97 = arith.constant 0 : index
      %215 = vector.load %arg21[%c0_96, %c0_97] : memref<8x32xf32, #tpu.memory_space<vmem>>, vector<8x32xf32>
      tpu.vector_store %arg21[%c0_96, %c0_97], %214 {strides = array<i32>} : memref<8x32xf32, #tpu.memory_space<vmem>>, vector<8x32xf32>,
    } else {
    }
    %c0 = arith.constant 0 : index
    %c0_1 = arith.constant 0 : index
    %3 = vector.load %arg21[%c0, %c0_1] : memref<8x32xf32, #tpu.memory_space<vmem>>, vector<8x32xf32>
    %c0_2 = arith.constant 0 : index
    %c0_3 = arith.constant 0 : index
    %c0_4 = arith.constant 0 : index
    %4 = vector.load %arg3[%c0_2, %c0_3, %c0_4] : memref<1x8x32xf32, #tpu.memory_space<vmem>>, vector<1x8x32xf32>
    %5 = vector.shape_cast %4 : vector<1x8x32xf32> to vector<8x32xf32>
    %6 = arith.truncf %5 : vector<8x32xf32> to vector<8x32xbf16>
    %c0_5 = arith.constant 0 : index
    %c0_6 = arith.constant 0 : index
    %c0_7 = arith.constant 0 : index
    %7 = vector.load %arg5[%c0_5, %c0_6, %c0_7] : memref<1x8x8xf32, #tpu.memory_space<vmem>>, vector<1x8x8xf32>
    %8 = vector.shape_cast %7 : vector<1x8x8xf32> to vector<8x8xf32>
    %cst = arith.constant 0.000000e+00 : f32
    %9 = vector.broadcast %cst : f32 to vector<8x8xf32>
    %10 = arith.cmpf oeq, %8, %9 : vector<8x8xf32>
    %cst_8 = arith.constant -1.000000e+09 : f32
    %cst_9 = arith.constant 0.000000e+00 : f32
    %11 = vector.broadcast %cst_8 : f32 to vector<8x8xf32>
    %12 = vector.broadcast %cst_9 : f32 to vector<8x8xf32>
    %13 = arith.select %10, %11, %12 : vector<8x8xi1>, vector<8x8xf32>
    %c0_10 = arith.constant 0 : index
    %c0_11 = arith.constant 0 : index
    %c0_12 = arith.constant 0 : index
    %14 = vector.load %arg4[%c0_10, %c0_11, %c0_12] : memref<1x1x8xf32, #tpu.memory_space<vmem>>, vector<1x1x8xf32>
    %15 = vector.shape_cast %14 : vector<1x1x8xf32> to vector<1x8xf32>
    %cst_13 = arith.constant 0.000000e+00 : f32
    %16 = vector.broadcast %cst_13 : f32 to vector<1x8xf32>
    %17 = arith.cmpf oeq, %15, %16 : vector<1x8xf32>
    %cst_14 = arith.constant -1.000000e+09 : f32
    %cst_15 = arith.constant 0.000000e+00 : f32
    %18 = vector.broadcast %cst_14 : f32 to vector<1x8xf32>
    %19 = vector.broadcast %cst_15 : f32 to vector<1x8xf32>
    %20 = arith.select %17, %18, %19 : vector<1x8xi1>, vector<1x8xf32>
    %c0_16 = arith.constant 0 : index
    %c0_17 = arith.constant 0 : index
    %c0_18 = arith.constant 0 : index
    %21 = vector.load %arg16[%c0_16, %c0_17, %c0_18] : memref<1x3x32xf32, #tpu.memory_space<vmem>>, vector<1x3x32xf32>
    %22 = vector.shape_cast %21 : vector<1x3x32xf32> to vector<3x32xf32>
    %c0_19 = arith.constant 0 : index
    %c0_20 = arith.constant 0 : index
    %c0_21 = arith.constant 0 : index
    %23 = vector.load %arg17[%c0_19, %c0_20, %c0_21] : memref<1x3x32xf32, #tpu.memory_space<vmem>>, vector<1x3x32xf32>
    %24 = vector.shape_cast %23 : vector<1x3x32xf32> to vector<3x32xf32>
    %c0_22 = arith.constant 0 : index
    %c0_23 = arith.constant 0 : index
    %c0_24 = arith.constant 0 : index
    %25 = vector.load %arg11[%c0_22, %c0_23, %c0_24] : memref<1x3x32xf32, #tpu.memory_space<vmem>>, vector<1x3x32xf32>
    %26 = vector.shape_cast %25 : vector<1x3x32xf32> to vector<3x32xf32>
    %27 = vector.extract_strided_slice %22 {offsets = [0, 0], sizes = [1, 32], strides = [1, 1]} : vector<3x32xf32> to vector<1x32xf32>
    %28 = vector.extract_strided_slice %24 {offsets = [0, 0], sizes = [1, 32], strides = [1, 1]} : vector<3x32xf32> to vector<1x32xf32>
    %cst_25 = arith.constant dense<0.000000e+00> : vector<8xf32>
    %29 = vector.multi_reduction <add>, %3, %cst_25 [1] : vector<8x32xf32> to vector<8xf32>
    %30 = vector.shape_cast %29 : vector<8xf32> to vector<8x1xf32>
    %cst_26 = arith.constant 3.200000e+01 : f32
    %31 = vector.broadcast %cst_26 : f32 to vector<8x1xf32>
    %32 = arith.divf %30, %31 : vector<8x1xf32>
    %33 = vector.broadcast %32 : vector<8x1xf32> to vector<8x32xf32>
    %34 = arith.subf %3, %33 : vector<8x32xf32>
    %35 = arith.mulf %34, %34 : vector<8x32xf32>
    %cst_27 = arith.constant dense<0.000000e+00> : vector<8xf32>
    %36 = vector.multi_reduction <add>, %35, %cst_27 [1] : vector<8x32xf32> to vector<8xf32>
    %37 = vector.shape_cast %36 : vector<8xf32> to vector<8x1xf32>
    %cst_28 = arith.constant 0.0322580636 : f32
    %38 = vector.broadcast %cst_28 : f32 to vector<8x1xf32>
    %39 = arith.mulf %37, %38 : vector<8x1xf32>
    %40 = vector.broadcast %27 : vector<1x32xf32> to vector<8x32xf32>
    %41 = arith.mulf %40, %34 : vector<8x32xf32>
    %42 = math.sqrt %39 : vector<8x1xf32>
    %cst_29 = arith.constant 9.99999997E-7 : f32
    %43 = vector.broadcast %cst_29 : f32 to vector<8x1xf32>
    %44 = arith.addf %42, %43 : vector<8x1xf32>
    %45 = vector.broadcast %44 : vector<8x1xf32> to vector<8x32xf32>
    %46 = arith.divf %41, %45 : vector<8x32xf32>
    %47 = vector.broadcast %28 : vector<1x32xf32> to vector<8x32xf32>
    %48 = arith.addf %46, %47 : vector<8x32xf32>
    %49 = arith.truncf %48 : vector<8x32xf32> to vector<8x32xbf16>
    %c0_30 = arith.constant 0 : index
    %c0_31 = arith.constant 0 : index
    %c0_32 = arith.constant 0 : index
    %50 = vector.load %arg6[%c0_30, %c0_31, %c0_32] : memref<1x32x96xbf16, #tpu.memory_space<vmem>>, vector<1x32x96xbf16>
    %51 = vector.shape_cast %50 : vector<1x32x96xbf16> to vector<32x96xbf16>
    %cst_33 = arith.constant dense<0.000000e+00> : vector<8x96xf32>
    %52 = tpu.matmul %49, %51, %cst_33 {dimension_numbers = #tpu.dot_dimension_numbers<[1], [0], [0], [1], [0, 0, 1, 1], [], []>} : vector<8x32xbf16>, vector<32x96xbf16>, vector<8x96xf32> -> vector<8x96xf32>
    %c0_34 = arith.constant 0 : index
    %c0_35 = arith.constant 0 : index
    %c0_36 = arith.constant 0 : index
    %53 = vector.load %arg7[%c0_34, %c0_35, %c0_36] : memref<1x1x96xf32, #tpu.memory_space<vmem>>, vector<1x1x96xf32>
    %54 = vector.shape_cast %53 : vector<1x1x96xf32> to vector<1x96xf32>
    %55 = vector.broadcast %54 : vector<1x96xf32> to vector<8x96xf32>
    %56 = arith.addf %52, %55 : vector<8x96xf32>
    %57 = vector.extract_strided_slice %56 {offsets = [0, 0], sizes = [8, 32], strides = [1, 1]} : vector<8x96xf32> to vector<8x32xf32>
    %58 = vector.extract_strided_slice %56 {offsets = [0, 32], sizes = [8, 32], strides = [1, 1]} : vector<8x96xf32> to vector<8x32xf32>
    %59 = vector.extract_strided_slice %56 {offsets = [0, 64], sizes = [8, 32], strides = [1, 1]} : vector<8x96xf32> to vector<8x32xf32>
    %60 = vector.shape_cast %57 : vector<8x32xf32> to vector<8x4x8xf32>
    %61 = tpu.transpose %60, [1, 0, 2] : vector<8x4x8xf32> -> vector<4x8x8xf32>
    %62 = arith.truncf %61 : vector<4x8x8xf32> to vector<4x8x8xbf16>
    %63 = vector.shape_cast %58 : vector<8x32xf32> to vector<8x4x8xf32>
    %64 = tpu.transpose %63, [1, 0, 2] : vector<8x4x8xf32> -> vector<4x8x8xf32>
    %65 = arith.truncf %64 : vector<4x8x8xf32> to vector<4x8x8xbf16>
    %66 = vector.shape_cast %59 : vector<8x32xf32> to vector<8x4x8xf32>
    %67 = tpu.transpose %66, [1, 0, 2] : vector<8x4x8xf32> -> vector<4x8x8xf32>
    %68 = arith.truncf %67 : vector<4x8x8xf32> to vector<4x8x8xbf16>
    "tpu.trace_start"() <{level = 10 : i32, message = "hqd,hkd->hqk"}> : () -> ()
    %cst_37 = arith.constant dense<0.000000e+00> : vector<4x8x8xf32>
    %69 = tpu.matmul %62, %65, %cst_37 {dimension_numbers = #tpu.dot_dimension_numbers<[2], [2], [1], [1], [0, 0, 0, 1, 1, 1], [0], [0]>} : vector<4x8x8xbf16>, vector<4x8x8xbf16>, vector<4x8x8xf32> -> vector<4x8x8xf32>
    "tpu.trace_stop"() : () -> ()
    %70 = vector.shape_cast %13 : vector<8x8xf32> to vector<1x8x8xf32>
    %71 = vector.broadcast %70 : vector<1x8x8xf32> to vector<4x8x8xf32>
    %72 = arith.addf %69, %71 : vector<4x8x8xf32>
    %cst_38 = arith.constant dense<0xFF800000> : vector<4x8xf32>
    %73 = vector.multi_reduction <maximumf>, %72, %cst_38 [2] : vector<4x8x8xf32> to vector<4x8xf32>
    %74 = vector.shape_cast %73 : vector<4x8xf32> to vector<4x8x1xf32>
    %75 = vector.broadcast %74 : vector<4x8x1xf32> to vector<4x8x8xf32>
    %76 = arith.subf %72, %75 : vector<4x8x8xf32>
    %77 = math.exp %76 : vector<4x8x8xf32>
    %cst_39 = arith.constant dense<0.000000e+00> : vector<4x8xf32>
    %78 = vector.multi_reduction <add>, %77, %cst_39 [2] : vector<4x8x8xf32> to vector<4x8xf32>
    %79 = vector.shape_cast %78 : vector<4x8xf32> to vector<4x8x1xf32>
    %80 = tpu.reciprocal %79 {approx = true} : vector<4x8x1xf32> -> vector<4x8x1xf32>
    %81 = vector.broadcast %80 : vector<4x8x1xf32> to vector<4x8x8xf32>
    %82 = arith.mulf %77, %81 : vector<4x8x8xf32>
    %83 = arith.truncf %82 : vector<4x8x8xf32> to vector<4x8x8xbf16>
    "tpu.trace_start"() <{level = 10 : i32, message = "hqk,hkd->hqd"}> : () -> ()
    %cst_40 = arith.constant dense<0.000000e+00> : vector<4x8x8xf32>
    %84 = tpu.matmul %83, %68, %cst_40 {dimension_numbers = #tpu.dot_dimension_numbers<[2], [1], [1], [2], [0, 0, 0, 1, 1, 2], [0], [0]>} : vector<4x8x8xbf16>, vector<4x8x8xbf16>, vector<4x8x8xf32> -> vector<4x8x8xf32>
    "tpu.trace_stop"() : () -> ()
    %85 = tpu.transpose %84, [1, 0, 2] : vector<4x8x8xf32> -> vector<8x4x8xf32>
    %86 = vector.shape_cast %85 : vector<8x4x8xf32> to vector<8x32xf32>
    %87 = arith.truncf %86 : vector<8x32xf32> to vector<8x32xbf16>
    %c0_41 = arith.constant 0 : index
    %c0_42 = arith.constant 0 : index
    %c0_43 = arith.constant 0 : index
    %c0_44 = arith.constant 0 : index
    %88 = vector.load %arg10[%c0_41, %c0_42, %c0_43, %c0_44] : memref<1x3x32x32xbf16, #tpu.memory_space<vmem>>, vector<1x1x32x32xbf16>
    %89 = vector.shape_cast %88 : vector<1x1x32x32xbf16> to vector<32x32xbf16>
    %cst_45 = arith.constant dense<0.000000e+00> : vector<8x32xf32>
    %90 = tpu.matmul %87, %89, %cst_45 {dimension_numbers = #tpu.dot_dimension_numbers<[1], [0], [0], [1], [0, 0, 1, 1], [], []>} : vector<8x32xbf16>, vector<32x32xbf16>, vector<8x32xf32> -> vector<8x32xf32>
    %91 = arith.addf %3, %90 : vector<8x32xf32>
    %92 = vector.extract_strided_slice %26 {offsets = [0, 0], sizes = [1, 32], strides = [1, 1]} : vector<3x32xf32> to vector<1x32xf32>
    %93 = vector.broadcast %92 : vector<1x32xf32> to vector<8x32xf32>
    %94 = arith.addf %91, %93 : vector<8x32xf32>
    %95 = vector.extract_strided_slice %22 {offsets = [1, 0], sizes = [1, 32], strides = [1, 1]} : vector<3x32xf32> to vector<1x32xf32>
    %96 = vector.extract_strided_slice %24 {offsets = [1, 0], sizes = [1, 32], strides = [1, 1]} : vector<3x32xf32> to vector<1x32xf32>
    %cst_46 = arith.constant dense<0.000000e+00> : vector<8xf32>
    %97 = vector.multi_reduction <add>, %94, %cst_46 [1] : vector<8x32xf32> to vector<8xf32>
    %98 = vector.shape_cast %97 : vector<8xf32> to vector<8x1xf32>
    %cst_47 = arith.constant 3.200000e+01 : f32
    %99 = vector.broadcast %cst_47 : f32 to vector<8x1xf32>
    %100 = arith.divf %98, %99 : vector<8x1xf32>
    %101 = vector.broadcast %100 : vector<8x1xf32> to vector<8x32xf32>
    %102 = arith.subf %94, %101 : vector<8x32xf32>
    %103 = arith.mulf %102, %102 : vector<8x32xf32>
    %cst_48 = arith.constant dense<0.000000e+00> : vector<8xf32>
    %104 = vector.multi_reduction <add>, %103, %cst_48 [1] : vector<8x32xf32> to vector<8xf32>
    %105 = vector.shape_cast %104 : vector<8xf32> to vector<8x1xf32>
    %cst_49 = arith.constant 0.0322580636 : f32
    %106 = vector.broadcast %cst_49 : f32 to vector<8x1xf32>
    %107 = arith.mulf %105, %106 : vector<8x1xf32>
    %108 = vector.broadcast %95 : vector<1x32xf32> to vector<8x32xf32>
    %109 = arith.mulf %108, %102 : vector<8x32xf32>
    %110 = math.sqrt %107 : vector<8x1xf32>
    %cst_50 = arith.constant 9.99999997E-7 : f32
    %111 = vector.broadcast %cst_50 : f32 to vector<8x1xf32>
    %112 = arith.addf %110, %111 : vector<8x1xf32>
    %113 = vector.broadcast %112 : vector<8x1xf32> to vector<8x32xf32>
    %114 = arith.divf %109, %113 : vector<8x32xf32>
    %115 = vector.broadcast %96 : vector<1x32xf32> to vector<8x32xf32>
    %116 = arith.addf %114, %115 : vector<8x32xf32>
    %117 = arith.truncf %116 : vector<8x32xf32> to vector<8x32xbf16>
    %c0_51 = arith.constant 0 : index
    %c1 = arith.constant 1 : index
    %c0_52 = arith.constant 0 : index
    %c0_53 = arith.constant 0 : index
    %118 = vector.load %arg10[%c0_51, %c1, %c0_52, %c0_53] : memref<1x3x32x32xbf16, #tpu.memory_space<vmem>>, vector<1x1x32x32xbf16>
    %119 = vector.shape_cast %118 : vector<1x1x32x32xbf16> to vector<32x32xbf16>
    %cst_54 = arith.constant dense<0.000000e+00> : vector<8x32xf32>
    %120 = tpu.matmul %117, %119, %cst_54 {dimension_numbers = #tpu.dot_dimension_numbers<[1], [0], [0], [1], [0, 0, 1, 1], [], []>} : vector<8x32xbf16>, vector<32x32xbf16>, vector<8x32xf32> -> vector<8x32xf32>
    %121 = vector.extract_strided_slice %26 {offsets = [1, 0], sizes = [1, 32], strides = [1, 1]} : vector<3x32xf32> to vector<1x32xf32>
    %122 = vector.broadcast %121 : vector<1x32xf32> to vector<8x32xf32>
    %123 = arith.addf %120, %122 : vector<8x32xf32>
    %c0_55 = arith.constant 0 : index
    %c0_56 = arith.constant 0 : index
    %c0_57 = arith.constant 0 : index
    %124 = vector.load %arg8[%c0_55, %c0_56, %c0_57] : memref<1x32x64xbf16, #tpu.memory_space<vmem>>, vector<1x32x64xbf16>
    %125 = vector.shape_cast %124 : vector<1x32x64xbf16> to vector<32x64xbf16>
    %cst_58 = arith.constant dense<0.000000e+00> : vector<8x64xf32>
    %126 = tpu.matmul %6, %125, %cst_58 {dimension_numbers = #tpu.dot_dimension_numbers<[1], [0], [0], [1], [0, 0, 1, 1], [], []>} : vector<8x32xbf16>, vector<32x64xbf16>, vector<8x64xf32> -> vector<8x64xf32>
    %c0_59 = arith.constant 0 : index
    %c0_60 = arith.constant 0 : index
    %c0_61 = arith.constant 0 : index
    %127 = vector.load %arg9[%c0_59, %c0_60, %c0_61] : memref<1x1x64xf32, #tpu.memory_space<vmem>>, vector<1x1x64xf32>
    %128 = vector.shape_cast %127 : vector<1x1x64xf32> to vector<1x64xf32>
    %129 = vector.broadcast %128 : vector<1x64xf32> to vector<8x64xf32>
    %130 = arith.addf %126, %129 : vector<8x64xf32>
    %131 = vector.extract_strided_slice %130 {offsets = [0, 0], sizes = [8, 32], strides = [1, 1]} : vector<8x64xf32> to vector<8x32xf32>
    %132 = vector.extract_strided_slice %130 {offsets = [0, 32], sizes = [8, 32], strides = [1, 1]} : vector<8x64xf32> to vector<8x32xf32>
    %133 = vector.shape_cast %123 : vector<8x32xf32> to vector<8x4x8xf32>
    %134 = tpu.transpose %133, [1, 0, 2] : vector<8x4x8xf32> -> vector<4x8x8xf32>
    %135 = arith.truncf %134 : vector<4x8x8xf32> to vector<4x8x8xbf16>
    %136 = vector.shape_cast %131 : vector<8x32xf32> to vector<8x4x8xf32>
    %137 = tpu.transpose %136, [1, 0, 2] : vector<8x4x8xf32> -> vector<4x8x8xf32>
    %138 = arith.truncf %137 : vector<4x8x8xf32> to vector<4x8x8xbf16>
    %139 = vector.shape_cast %132 : vector<8x32xf32> to vector<8x4x8xf32>
    %140 = tpu.transpose %139, [1, 0, 2] : vector<8x4x8xf32> -> vector<4x8x8xf32>
    %141 = arith.truncf %140 : vector<4x8x8xf32> to vector<4x8x8xbf16>
    "tpu.trace_start"() <{level = 10 : i32, message = "hqd,hkd->hqk"}> : () -> ()
    %cst_62 = arith.constant dense<0.000000e+00> : vector<4x8x8xf32>
    %142 = tpu.matmul %135, %138, %cst_62 {dimension_numbers = #tpu.dot_dimension_numbers<[2], [2], [1], [1], [0, 0, 0, 1, 1, 1], [0], [0]>} : vector<4x8x8xbf16>, vector<4x8x8xbf16>, vector<4x8x8xf32> -> vector<4x8x8xf32>
    "tpu.trace_stop"() : () -> ()
    %143 = vector.shape_cast %20 : vector<1x8xf32> to vector<1x1x8xf32>
    %144 = vector.broadcast %143 : vector<1x1x8xf32> to vector<4x8x8xf32>
    %145 = arith.addf %142, %144 : vector<4x8x8xf32>
    %cst_63 = arith.constant dense<0xFF800000> : vector<4x8xf32>
    %146 = vector.multi_reduction <maximumf>, %145, %cst_63 [2] : vector<4x8x8xf32> to vector<4x8xf32>
    %147 = vector.shape_cast %146 : vector<4x8xf32> to vector<4x8x1xf32>
    %148 = vector.broadcast %147 : vector<4x8x1xf32> to vector<4x8x8xf32>
    %149 = arith.subf %145, %148 : vector<4x8x8xf32>
    %150 = math.exp %149 : vector<4x8x8xf32>
    %cst_64 = arith.constant dense<0.000000e+00> : vector<4x8xf32>
    %151 = vector.multi_reduction <add>, %150, %cst_64 [2] : vector<4x8x8xf32> to vector<4x8xf32>
    %152 = vector.shape_cast %151 : vector<4x8xf32> to vector<4x8x1xf32>
    %153 = tpu.reciprocal %152 {approx = true} : vector<4x8x1xf32> -> vector<4x8x1xf32>
    %154 = vector.broadcast %153 : vector<4x8x1xf32> to vector<4x8x8xf32>
    %155 = arith.mulf %150, %154 : vector<4x8x8xf32>
    %156 = arith.truncf %155 : vector<4x8x8xf32> to vector<4x8x8xbf16>
    "tpu.trace_start"() <{level = 10 : i32, message = "hqk,hkd->hqd"}> : () -> ()
    %cst_65 = arith.constant dense<0.000000e+00> : vector<4x8x8xf32>
    %157 = tpu.matmul %156, %141, %cst_65 {dimension_numbers = #tpu.dot_dimension_numbers<[2], [1], [1], [2], [0, 0, 0, 1, 1, 2], [0], [0]>} : vector<4x8x8xbf16>, vector<4x8x8xbf16>, vector<4x8x8xf32> -> vector<4x8x8xf32>
    "tpu.trace_stop"() : () -> ()
    %158 = tpu.transpose %157, [1, 0, 2] : vector<4x8x8xf32> -> vector<8x4x8xf32>
    %159 = vector.shape_cast %158 : vector<8x4x8xf32> to vector<8x32xf32>
    %160 = arith.truncf %159 : vector<8x32xf32> to vector<8x32xbf16>
    %c0_66 = arith.constant 0 : index
    %c2 = arith.constant 2 : index
    %c0_67 = arith.constant 0 : index
    %c0_68 = arith.constant 0 : index
    %161 = vector.load %arg10[%c0_66, %c2, %c0_67, %c0_68] : memref<1x3x32x32xbf16, #tpu.memory_space<vmem>>, vector<1x1x32x32xbf16>
    %162 = vector.shape_cast %161 : vector<1x1x32x32xbf16> to vector<32x32xbf16>
    %cst_69 = arith.constant dense<0.000000e+00> : vector<8x32xf32>
    %163 = tpu.matmul %160, %162, %cst_69 {dimension_numbers = #tpu.dot_dimension_numbers<[1], [0], [0], [1], [0, 0, 1, 1], [], []>} : vector<8x32xbf16>, vector<32x32xbf16>, vector<8x32xf32> -> vector<8x32xf32>
    %164 = arith.addf %94, %163 : vector<8x32xf32>
    %165 = vector.extract_strided_slice %26 {offsets = [2, 0], sizes = [1, 32], strides = [1, 1]} : vector<3x32xf32> to vector<1x32xf32>
    %166 = vector.broadcast %165 : vector<1x32xf32> to vector<8x32xf32>
    %167 = arith.addf %164, %166 : vector<8x32xf32>
    %168 = vector.extract_strided_slice %22 {offsets = [2, 0], sizes = [1, 32], strides = [1, 1]} : vector<3x32xf32> to vector<1x32xf32>
    %169 = vector.extract_strided_slice %24 {offsets = [2, 0], sizes = [1, 32], strides = [1, 1]} : vector<3x32xf32> to vector<1x32xf32>
    %cst_70 = arith.constant dense<0.000000e+00> : vector<8xf32>
    %170 = vector.multi_reduction <add>, %167, %cst_70 [1] : vector<8x32xf32> to vector<8xf32>
    %171 = vector.shape_cast %170 : vector<8xf32> to vector<8x1xf32>
    %cst_71 = arith.constant 3.200000e+01 : f32
    %172 = vector.broadcast %cst_71 : f32 to vector<8x1xf32>
    %173 = arith.divf %171, %172 : vector<8x1xf32>
    %174 = vector.broadcast %173 : vector<8x1xf32> to vector<8x32xf32>
    %175 = arith.subf %167, %174 : vector<8x32xf32>
    %176 = arith.mulf %175, %175 : vector<8x32xf32>
    %cst_72 = arith.constant dense<0.000000e+00> : vector<8xf32>
    %177 = vector.multi_reduction <add>, %176, %cst_72 [1] : vector<8x32xf32> to vector<8xf32>
    %178 = vector.shape_cast %177 : vector<8xf32> to vector<8x1xf32>
    %cst_73 = arith.constant 0.0322580636 : f32
    %179 = vector.broadcast %cst_73 : f32 to vector<8x1xf32>
    %180 = arith.mulf %178, %179 : vector<8x1xf32>
    %181 = vector.broadcast %168 : vector<1x32xf32> to vector<8x32xf32>
    %182 = arith.mulf %181, %175 : vector<8x32xf32>
    %183 = math.sqrt %180 : vector<8x1xf32>
    %cst_74 = arith.constant 9.99999997E-7 : f32
    %184 = vector.broadcast %cst_74 : f32 to vector<8x1xf32>
    %185 = arith.addf %183, %184 : vector<8x1xf32>
    %186 = vector.broadcast %185 : vector<8x1xf32> to vector<8x32xf32>
    %187 = arith.divf %182, %186 : vector<8x32xf32>
    %188 = vector.broadcast %169 : vector<1x32xf32> to vector<8x32xf32>
    %189 = arith.addf %187, %188 : vector<8x32xf32>
    %190 = arith.truncf %189 : vector<8x32xf32> to vector<8x32xbf16>
    %c0_75 = arith.constant 0 : index
    %c0_76 = arith.constant 0 : index
    %c0_77 = arith.constant 0 : index
    %191 = vector.load %arg12[%c0_75, %c0_76, %c0_77] : memref<1x32x64xbf16, #tpu.memory_space<vmem>>, vector<1x32x64xbf16>
    %192 = vector.shape_cast %191 : vector<1x32x64xbf16> to vector<32x64xbf16>
    %cst_78 = arith.constant dense<0.000000e+00> : vector<8x64xf32>
    %193 = tpu.matmul %190, %192, %cst_78 {dimension_numbers = #tpu.dot_dimension_numbers<[1], [0], [0], [1], [0, 0, 1, 1], [], []>} : vector<8x32xbf16>, vector<32x64xbf16>, vector<8x64xf32> -> vector<8x64xf32>
    %c0_79 = arith.constant 0 : index
    %c0_80 = arith.constant 0 : index
    %c0_81 = arith.constant 0 : index
    %194 = vector.load %arg13[%c0_79, %c0_80, %c0_81] : memref<1x1x64xf32, #tpu.memory_space<vmem>>, vector<1x1x64xf32>
    %195 = vector.shape_cast %194 : vector<1x1x64xf32> to vector<1x64xf32>
    %196 = vector.broadcast %195 : vector<1x64xf32> to vector<8x64xf32>
    %197 = arith.addf %193, %196 : vector<8x64xf32>
    %cst_82 = arith.constant 0.000000e+00 : f32
    %198 = vector.broadcast %cst_82 : f32 to vector<8x64xf32>
    %199 = arith.maximumf %197, %198 : vector<8x64xf32>
    %200 = arith.truncf %199 : vector<8x64xf32> to vector<8x64xbf16>
    %c0_83 = arith.constant 0 : index
    %c0_84 = arith.constant 0 : index
    %c0_85 = arith.constant 0 : index
    %201 = vector.load %arg14[%c0_83, %c0_84, %c0_85] : memref<1x64x32xbf16, #tpu.memory_space<vmem>>, vector<1x64x32xbf16>
    %202 = vector.shape_cast %201 : vector<1x64x32xbf16> to vector<64x32xbf16>
    %cst_86 = arith.constant dense<0.000000e+00> : vector<8x32xf32>
    %203 = tpu.matmul %200, %202, %cst_86 {dimension_numbers = #tpu.dot_dimension_numbers<[1], [0], [0], [1], [0, 0, 1, 1], [], []>} : vector<8x64xbf16>, vector<64x32xbf16>, vector<8x32xf32> -> vector<8x32xf32>
    %204 = arith.addf %167, %203 : vector<8x32xf32>
    %c0_87 = arith.constant 0 : index
    %c0_88 = arith.constant 0 : index
    %c0_89 = arith.constant 0 : index
    %205 = vector.load %arg15[%c0_87, %c0_88, %c0_89] : memref<1x1x32xf32, #tpu.memory_space<vmem>>, vector<1x1x32xf32>
    %206 = vector.shape_cast %205 : vector<1x1x32xf32> to vector<1x32xf32>
    %207 = vector.broadcast %206 : vector<1x32xf32> to vector<8x32xf32>
    %208 = arith.addf %204, %207 : vector<8x32xf32>
    %c0_90 = arith.constant 0 : index
    %c0_91 = arith.constant 0 : index
    %209 = vector.load %arg21[%c0_90, %c0_91] : memref<8x32xf32, #tpu.memory_space<vmem>>, vector<8x32xf32>
    tpu.vector_store %arg21[%c0_90, %c0_91], %208 {strides = array<i32>} : memref<8x32xf32, #tpu.memory_space<vmem>>, vector<8x32xf32>,
    %c1_i32 = arith.constant 1 : i32
    %210 = arith.cmpi eq, %arg1, %c1_i32 : i32
    %211 = arith.extui %210 : i1 to i32
    %c0_i32_92 = arith.constant 0 : i32
    %212 = arith.cmpi ne, %211, %c0_i32_92 : i32
    scf.if %212 {
      %c0_93 = arith.constant 0 : index
      %c0_94 = arith.constant 0 : index
      %213 = vector.load %arg18[%c0_93, %c0_94] : memref<1x32xf32, #tpu.memory_space<vmem>>, vector<1x32xf32>
      %c0_95 = arith.constant 0 : index
      %c0_96 = arith.constant 0 : index
      %214 = vector.load %arg19[%c0_95, %c0_96] : memref<1x32xf32, #tpu.memory_space<vmem>>, vector<1x32xf32>
      %cst_97 = arith.constant dense<0.000000e+00> : vector<8xf32>
      %215 = vector.multi_reduction <add>, %208, %cst_97 [1] : vector<8x32xf32> to vector<8xf32>
      %216 = vector.shape_cast %215 : vector<8xf32> to vector<8x1xf32>
      %cst_98 = arith.constant 3.200000e+01 : f32
      %217 = vector.broadcast %cst_98 : f32 to vector<8x1xf32>
      %218 = arith.divf %216, %217 : vector<8x1xf32>
      %219 = vector.broadcast %218 : vector<8x1xf32> to vector<8x32xf32>
      %220 = arith.subf %208, %219 : vector<8x32xf32>
      %221 = arith.mulf %220, %220 : vector<8x32xf32>
      %cst_99 = arith.constant dense<0.000000e+00> : vector<8xf32>
      %222 = vector.multi_reduction <add>, %221, %cst_99 [1] : vector<8x32xf32> to vector<8xf32>
      %223 = vector.shape_cast %222 : vector<8xf32> to vector<8x1xf32>
      %cst_100 = arith.constant 0.0322580636 : f32
      %224 = vector.broadcast %cst_100 : f32 to vector<8x1xf32>
      %225 = arith.mulf %223, %224 : vector<8x1xf32>
      %226 = vector.broadcast %213 : vector<1x32xf32> to vector<8x32xf32>
      %227 = arith.mulf %226, %220 : vector<8x32xf32>
      %228 = math.sqrt %225 : vector<8x1xf32>
      %cst_101 = arith.constant 9.99999997E-7 : f32
      %229 = vector.broadcast %cst_101 : f32 to vector<8x1xf32>
      %230 = arith.addf %228, %229 : vector<8x1xf32>
      %231 = vector.broadcast %230 : vector<8x1xf32> to vector<8x32xf32>
      %232 = arith.divf %227, %231 : vector<8x32xf32>
      %233 = vector.broadcast %214 : vector<1x32xf32> to vector<8x32xf32>
      %234 = arith.addf %232, %233 : vector<8x32xf32>
      %c0_102 = arith.constant 0 : index
      %c0_103 = arith.constant 0 : index
      %c0_104 = arith.constant 0 : index
      %235 = vector.load %arg20[%c0_102, %c0_103, %c0_104] : memref<1x8x32xf32, #tpu.memory_space<vmem>>, vector<1x8x32xf32>
      %236 = vector.shape_cast %235 : vector<1x8x32xf32> to vector<8x32xf32>
      %237 = vector.shape_cast %234 : vector<8x32xf32> to vector<1x8x32xf32>
      tpu.vector_store %arg20[%c0_102, %c0_103, %c0_104], %237 {strides = array<i32>} : memref<1x8x32xf32, #tpu.memory_space<vmem>>, vector<1x8x32xf32>,
    } else {
    }
    return
  }
  func.func @transform_0(%arg0: i32, %arg1: i32) -> (i32, i32, i32) {
    %c0_i32 = arith.constant 0 : i32
    %c0_i32_0 = arith.constant 0 : i32
    %c0_i32_1 = arith.constant 0 : i32
    return %arg0, %c0_i32, %c0_i32_0 : i32, i32, i32
  }
  func.func @transform_1(%arg0: i32, %arg1: i32) -> (i32, i32, i32) {
    %c0_i32 = arith.constant 0 : i32
    %c0_i32_0 = arith.constant 0 : i32
    %c0_i32_1 = arith.constant 0 : i32
    return %arg0, %c0_i32, %c0_i32_0 : i32, i32, i32
  }
  func.func @transform_2(%arg0: i32, %arg1: i32) -> (i32, i32, i32) {
    %c0_i32 = arith.constant 0 : i32
    %c0_i32_0 = arith.constant 0 : i32
    %c0_i32_1 = arith.constant 0 : i32
    return %arg0, %c0_i32, %c0_i32_0 : i32, i32, i32
  }
  func.func @transform_3(%arg0: i32, %arg1: i32) -> (i32, i32, i32) {
    %c0_i32 = arith.constant 0 : i32
    %c0_i32_0 = arith.constant 0 : i32
    %c0_i32_1 = arith.constant 0 : i32
    return %arg0, %c0_i32, %c0_i32_0 : i32, i32, i32
  }
  func.func @transform_4(%arg0: i32, %arg1: i32) -> (i32, i32, i32) {
    %c0_i32 = arith.constant 0 : i32
    %c0_i32_0 = arith.constant 0 : i32
    %c0_i32_1 = arith.constant 0 : i32
    return %arg1, %c0_i32, %c0_i32_0 : i32, i32, i32
  }
  func.func @transform_5(%arg0: i32, %arg1: i32) -> (i32, i32, i32) {
    %c0_i32 = arith.constant 0 : i32
    %c0_i32_0 = arith.constant 0 : i32
    %c0_i32_1 = arith.constant 0 : i32
    return %arg1, %c0_i32, %c0_i32_0 : i32, i32, i32
  }
  func.func @transform_6(%arg0: i32, %arg1: i32) -> (i32, i32, i32) {
    %c0_i32 = arith.constant 0 : i32
    %c0_i32_0 = arith.constant 0 : i32
    %c0_i32_1 = arith.constant 0 : i32
    return %arg1, %c0_i32, %c0_i32_0 : i32, i32, i32
  }
  func.func @transform_7(%arg0: i32, %arg1: i32) -> (i32, i32, i32) {
    %c0_i32 = arith.constant 0 : i32
    %c0_i32_0 = arith.constant 0 : i32
    %c0_i32_1 = arith.constant 0 : i32
    return %arg1, %c0_i32, %c0_i32_0 : i32, i32, i32
  }
  func.func @transform_8(%arg0: i32, %arg1: i32) -> (i32, i32, i32, i32) {
    %c0_i32 = arith.constant 0 : i32
    %c0_i32_0 = arith.constant 0 : i32
    %c0_i32_1 = arith.constant 0 : i32
    %c0_i32_2 = arith.constant 0 : i32
    return %arg1, %c0_i32, %c0_i32_0, %c0_i32_1 : i32, i32, i32, i32
  }
  func.func @transform_9(%arg0: i32, %arg1: i32) -> (i32, i32, i32) {
    %c0_i32 = arith.constant 0 : i32
    %c0_i32_0 = arith.constant 0 : i32
    %c0_i32_1 = arith.constant 0 : i32
    return %arg1, %c0_i32, %c0_i32_0 : i32, i32, i32
  }
  func.func @transform_10(%arg0: i32, %arg1: i32) -> (i32, i32, i32) {
    %c0_i32 = arith.constant 0 : i32
    %c0_i32_0 = arith.constant 0 : i32
    %c0_i32_1 = arith.constant 0 : i32
    return %arg1, %c0_i32, %c0_i32_0 : i32, i32, i32
  }
  func.func @transform_11(%arg0: i32, %arg1: i32) -> (i32, i32, i32) {
    %c0_i32 = arith.constant 0 : i32
    %c0_i32_0 = arith.constant 0 : i32
    %c0_i32_1 = arith.constant 0 : i32
    return %arg1, %c0_i32, %c0_i32_0 : i32, i32, i32
  }
  func.func @transform_12(%arg0: i32, %arg1: i32) -> (i32, i32, i32) {
    %c0_i32 = arith.constant 0 : i32
    %c0_i32_0 = arith.constant 0 : i32
    %c0_i32_1 = arith.constant 0 : i32
    return %arg1, %c0_i32, %c0_i32_0 : i32, i32, i32
  }
  func.func @transform_13(%arg0: i32, %arg1: i32) -> (i32, i32, i32) {
    %c0_i32 = arith.constant 0 : i32
    %c0_i32_0 = arith.constant 0 : i32
    %c0_i32_1 = arith.constant 0 : i32
    return %arg1, %c0_i32, %c0_i32_0 : i32, i32, i32
  }
  func.func @transform_14(%arg0: i32, %arg1: i32) -> (i32, i32, i32) {
    %c0_i32 = arith.constant 0 : i32
    %c0_i32_0 = arith.constant 0 : i32
    %c0_i32_1 = arith.constant 0 : i32
    return %arg1, %c0_i32, %c0_i32_0 : i32, i32, i32
  }
  func.func @transform_15(%arg0: i32, %arg1: i32) -> (i32, i32, i32) {
    %c0_i32 = arith.constant 0 : i32
    %c0_i32_0 = arith.constant 0 : i32
    %c0_i32_1 = arith.constant 0 : i32
    return %arg1, %c0_i32, %c0_i32_0 : i32, i32, i32
  }
  func.func @transform_16(%arg0: i32, %arg1: i32) -> (i32, i32) {
    %c0_i32 = arith.constant 0 : i32
    %c0_i32_0 = arith.constant 0 : i32
    %c0_i32_1 = arith.constant 0 : i32
    return %c0_i32, %c0_i32_0 : i32, i32
  }
  func.func @transform_17(%arg0: i32, %arg1: i32) -> (i32, i32) {
    %c0_i32 = arith.constant 0 : i32
    %c0_i32_0 = arith.constant 0 : i32
    %c0_i32_1 = arith.constant 0 : i32
    return %c0_i32, %c0_i32_0 : i32, i32
  }
  func.func @transform_18(%arg0: i32, %arg1: i32) -> (i32, i32, i32) {
    %c0_i32 = arith.constant 0 : i32
    %c0_i32_0 = arith.constant 0 : i32
    %c0_i32_1 = arith.constant 0 : i32
    return %arg0, %c0_i32, %c0_i32_0 : i32, i32, i32
  }
}

</mosaic_0001>

<bundles_post_ra>
// kernel: tpu_custom_call.1
= control target key start
LH: loop header
LB: loop body
LE: loop exit
PB: predicated region body
PF: predicated region fallthrough
CT: control target
= control target key end

     0   :  { %s6105_s0 = inlined_call_operand.hbm [shape: f32[2,8,32], index: 0, kind: input, shape index: {}]   ;;  %s6106_s1 = inlined_call_operand.hbm [shape: f32[2,8,32], index: 1, kind: input, shape index: {}]   ;;  %s6107_s2 = inlined_call_operand.hbm [shape: f32[2,1,8], index: 2, kind: input, shape index: {}]   ;;  %s6108_s3 = inlined_call_operand.hbm [shape: f32[2,8,8], index: 3, kind: input, shape index: {}]   ;;  %s6109_s4 = inlined_call_operand.vmem [shape: bf16[2,32,96], index: 4, kind: input, shape index: {}]   ;;  %s6110_s5 = inlined_call_operand.hbm [shape: f32[2,1,96], index: 5, kind: input, shape index: {}]   ;;  %s6111_s6 = inlined_call_operand.hbm [shape: bf16[2,32,64], index: 6, kind: input, shape index: {}]   ;;  %s6112_s7 = inlined_call_operand.hbm [shape: f32[2,1,64], index: 7, kind: input, shape index: {}]   ;;  %s6113_s8 = inlined_call_operand.vmem [shape: bf16[2,3,32,32], index: 8, kind: input, shape index: {}]   ;;  %s6114_s9 = inlined_call_operand.vmem [shape: f32[2,3,32], index: 9, kind: input, shape index: {}]   ;;  %s6115_s10 = inlined_call_operand.hbm [shape: bf16[2,32,64], index: 10, kind: input, shape index: {}]   ;;  %s6116_s11 = inlined_call_operand.vmem [shape: f32[2,1,64], index: 11, kind: input, shape index: {}]   ;;  %s6117_s12 = inlined_call_operand.vmem [shape: bf16[2,64,32], index: 12, kind: input, shape index: {}]   ;;  %s6118_s13 = inlined_call_operand.vmem [shape: f32[2,1,32], index: 13, kind: input, shape index: {}]   ;;  %s6119_s14 = inlined_call_operand.vmem [shape: f32[2,3,32], index: 14, kind: input, shape index: {}]   ;;  %s6120_s15 = inlined_call_operand.vmem [shape: f32[2,3,32], index: 15, kind: input, shape index: {}]   ;;  %s6121_s16 = inlined_call_operand.vmem [shape: f32[1,32], index: 16, kind: input, shape index: {}]   ;;  %s6122_s17 = inlined_call_operand.vmem [shape: f32[1,32], index: 17, kind: input, shape index: {}]   ;;  %s6123_s18 = inlined_call_operand.hbm [shape: f32[2,8,32], index: 18, kind: output, shape index: {}]  }
   0x1   :  { %6164 = sst [smem:[#allocation44_spill]] %s6105_s0 }
   0x2   :  { %6165 = sst [smem:[#allocation45_spill]] %s6106_s1 }
   0x3   :  { %6166 = sst [smem:[#allocation46_spill]] %s6107_s2 }
   0x4   :  { %6167 = sst [smem:[#allocation47_spill]] %s6108_s3 }
   0x5   :  { %6168 = sst [smem:[#allocation48_spill]] %s6109_s4 }
   0x6   :  { %6169 = sst [smem:[#allocation49_spill]] %s6110_s5 }
   0x7   :  { %6170 = sst [smem:[#allocation50_spill]] %s6111_s6 }
   0x8   :  { %6171 = sst [smem:[#allocation51_spill]] %s6112_s7 }
   0x9   :  { %6172 = sst [smem:[#allocation52_spill]] %s6113_s8 }
   0xa   :  { %6173 = sst [smem:[#allocation53_spill]] %s6114_s9 }
   0xb   :  { %6174 = sst [smem:[#allocation54_spill]] %s6115_s10 }
   0xc   :  { %6175 = sst [smem:[#allocation55_spill]] %s6116_s11 }
   0xd   :  { %6176 = sst [smem:[#allocation56_spill]] %s6117_s12 }
   0xe   :  { %6177 = sst [smem:[#allocation57_spill]] %s6118_s13 }
   0xf   :  { %6178 = sst [smem:[#allocation58_spill]] %s6119_s14 }
  0x10   :  { %6179 = sst [smem:[#allocation59_spill]] %s6120_s15 }
  0x11   :  { %6180 = sst [smem:[#allocation60_spill]] %s6121_s16 }
  0x12   :  { %6181 = sst [smem:[#allocation61_spill]] %s6122_s17 }
  0x13   :  { %6182 = sst [smem:[#allocation62_spill]] %s6123_s18 }
  0x14   :  { %23 = vsyncpa [#allocation4], 0 }
  0x15   :  { %25 = vsyncpa [#allocation4 + $0x1], 0 }
  0x16   :  { %26 = vsyncpa [#allocation7], 0 }
  0x17   :  { %28 = vsyncpa [#allocation7 + $0x1], 0 }
  0x18   :  { %29 = vsyncpa [#allocation10], 0 }
  0x19   :  { %31 = vsyncpa [#allocation10 + $0x1], 0 }
  0x1a   :  { %32 = vsyncpa [#allocation13], 0 }
  0x1b   :  { %34 = vsyncpa [#allocation13 + $0x1], 0 }
  0x1c   :  { %35 = vsyncpa [#allocation16], 0 }
  0x1d   :  { %37 = vsyncpa [#allocation16 + $0x1], 0 }
  0x1e   :  { %38 = vsyncpa [#allocation5], 0 }
  0x1f   :  { %40 = vsyncpa [#allocation5 + $0x1], 0  ;;  %s5050_s27 = smov 0   ;;  %s5052_s28 = smov 0  }
  0x20   :  { %s5054_s29 = smov 0   ;;  %s5056_s30 = smov 0  }
  0x21   :  { %s5058_s0 = smov 0   ;;  %s5060_s19 = smov 0  }
  0x22   :  { %s5062_s1 = smov 0   ;;  %s5064_s20 = smov 0  }
  0x23   :  { %s5066_s21 = smov 0   ;;  %s5068_s22 = smov 0  }
  0x24   :  { %s5070_s2 = smov 0  }
  0x25 LB: > { %6183 = sst [smem:[#allocation25_spill]] %s4894_s28  ;;  %s5104_s23 = sadd.s32 4294967295, %s4930_s2   ;;  %s4930_s2 = sphi %s5070_s2, %s46_s2   ;;  %s4926_s22 = sphi %s5068_s22, %s6283_s22   ;;  %s4922_s21 = sphi %s5066_s21, %s6282_s21   ;;  %s4918_s20 = sphi %s5064_s20, %s6281_s20   ;;  %s4914_s1 = sphi %s5062_s1, %s6280_s1   ;;  %s4910_s19 = sphi %s5060_s19, %s6279_s19   ;;  %s4906_s0 = sphi %s5058_s0, %s6278_s0   ;;  %s4902_s30 = sphi %s5056_s30, %s6277_s30   ;;  %s4898_s29 = sphi %s5054_s29, %s6276_s29   ;;  %s4894_s28 = sphi %s5052_s28, %s6275_s28   ;;  %s4890_s27 = sphi %s5050_s27, %s6274_s27  }
  0x26   : > { %6184 = sst [smem:[#allocation26_spill]] %s4898_s29  ;;  %s4007_s24 = sadd.s32 4294967294, %s4930_s2  }
  0x27   : > { %6185 = sst [smem:[#allocation27_spill]] %s4902_s30  ;;  %p72_p0 = scmp.ne.s32.totalorder %s4910_s19, %s4906_s0 }
  0x28   : > { %6186 = sst [smem:[#allocation28_spill]] %s4906_s0  ;;  %p73_p1 = scmp.eq.s32.totalorder %s4930_s2, 0 }
  0x29   : > { %6187 = sst [smem:[#allocation29_spill]] %s4910_s19  ;;  %p78_p2 = scmp.ne.s32.totalorder %s4906_s0, %s4902_s30 }
  0x2a   : > { %6188 = sst [smem:[#allocation30_spill]] %s4914_s1  ;;  %p79_p3 = scmp.eq.s32.totalorder %s5104_s23, 0 }
  0x2b   : > { %6189 = sst [smem:[#allocation31_spill]] %s4918_s20  ;;  %p5115_p4 = por %p73_p1, %p72_p0 }
  0x2c   : > { %6190 = sst [smem:[#allocation32_spill]] %s4922_s21  ;;  %p202_p5 = scmp.ne.s32.totalorder %s4898_s29, %s4894_s28 }
  0x2d   : > { %6191 = sst [smem:[#allocation33_spill]] %s4926_s22  ;;  %p5121_p6 = por %p79_p3, %p78_p2 }
  0x2e   : > { %6192 = sst [smem:[#allocation34_spill]] %s4930_s2  ;;  %p208_p7 = scmp.ne.s32.totalorder %s4894_s28, %s4890_s27 }
  0x2f   : > { %6193 = sst [smem:[#allocation35_spill]] %s5104_s23  ;;  %p5126_p8 = por %p202_p5, %p73_p1 }
  0x30   : > { %s6195_s20 = scalar_select %p5121_p6, 1, 0 }
  0x31   : > { %p534_p9 = scmp.eq.s32.totalorder %s5104_s23, 3  ;;  %p5131_p10 = por %p208_p7, %p79_p3 }
  0x32   : > { %6196 = sst [smem:[#allocation36_spill]] %s6195_s20  ;;  %p540_p11 = scmp.eq.s32.totalorder %s4007_s24, 3 }
  0x33   : > { %s6198_s25 = scalar_select %p5131_p10, 1, 0 }
  0x34   : > { %p5135_p12 = por %p534_p9, %p72_p0  ;;  %p5139_p13 = por %p540_p11, %p78_p2 }
  0x35   : > { %6199 = sst [smem:[#allocation37_spill]] %s6198_s25  ;;  %p4378_p6 = scmp.lt.s32.totalorder %s4930_s2, 4 }
  0x36   : > { %s6200_s30 = scalar_select %p5135_p12, 1, 0 }
  0x37   : > { %s6202_s17 = scalar_select %p5139_p13, 1, 0 }
  0x38   : > { %6201 = sst [smem:[#allocation38_spill]] %s6200_s30  ;;  %s5145_s27 = sand.u32 1, %s4910_s19  }
  0x39   : > { %6203 = sst [smem:[#allocation39_spill]] %s6202_s17  ;;  %s5148_s16 = sshll.u32 %s4926_s22, 7 }
  0x3a   : > { %s5151_s15 = sshll.u32 %s5145_s27, 3  ;;  %p5155_p1 = pnand %p4378_p6, %p5115_p4 }
  0x3b   : > { %s5160_s30 = sand.u32 1, %s4930_s2   ;;  %s6205_s13 = sld [smem:[#allocation45_spill]] }
  0x3c   : > { %s6204_s24 = scalar_select %p5155_p1, 1, 0 }
  0x3d   : > { %s588_s11 = scalar_lea.vmem [#allocation6], %s5151_s15  ;;  %p5173_p0 = pnand %p4378_p6, %p5126_p8 }
  0x3e   : > { %s595_s18 = sshll.u32 %s588_s11, 4  ;;  %p5182_p3 = pneg %p5155_p1  ;;  %s5169_s18 = int_to_ptr.vmem [resolvable:$true] %s595_s18 }
  0x3f   : > { %s6206_s9 = scalar_select %p5173_p0, 1, 0 }
  0x40   : > { %s6207_s14 = scalar_select %p5182_p3, 1, 0 }
  0x41   : > { %s5166_s12 = scalar_lea.hbm %s6205_s13, %s5148_s16  ;;  %s4553_s26 = scalar_lea.hbm %s6205_s13, 256 }
  0x42   : > { %s4548_s4 = scalar_lea.hbm %s5166_s12, 128  ;;  %p4554_p6 = scmp.lt.u32.totalorder %s5166_s12, %s6205_s13 }
  0x43   : > { %p4549_p2 = scmp.ne.s32.totalorder %s5166_s12, %s4548_s4  ;;  %p4555_p7 = scmp.lt.u32.totalorder %s4553_s26, %s4548_s4 }
  0x44   : > { %p4557_p9 = scmp.lt.u32.totalorder %s4548_s4, %s5166_s12 }
  0x45   : > { %p4551_p4 = pnand %p5182_p3, %p4549_p2  ;;  %p4556_p8 = por %p4555_p7, %p4554_p6 }
  0x47   : > { %p4552_p5 = pneg %p4551_p4  ;;  %p4558_p11 = por %p4557_p9, %p4556_p8 }
  0x49   : > { %p4559_p13 = pnand %p4558_p11, %p4552_p5 }
  0x4b   : > { %4562 = shalt.err (!%p4559_p13)
}
  0x4c   : > { %s4563_s8 = scalar_lea.vmem %s5169_s18, 128  ;;  %s4932_s11 = smov [#allocation6]  }
  0x4d   : > { %p4564_p2 = scmp.ne.s32.totalorder %s5169_s18, %s4563_s8  ;;  %s4568_s17 = sshll.u32 %s4932_s11, 4  ;;  %s4569_s17 = int_to_ptr.vmem [resolvable:$false] %s4568_s17 }
  0x4e   : > { %s4570_s1 = scalar_lea.vmem %s4569_s17, 256  ;;  %p4571_p10 = scmp.lt.s32.totalorder %s5169_s18, %s4569_s17 }
  0x4f   : > { %p4566_p4 = pnand %p4564_p2, %p5182_p3  ;;  %p4572_p0 = scmp.lt.s32.totalorder %s4570_s1, %s4563_s8 }
  0x51   : > { %p4567_p12 = pneg %p4566_p4  ;;  %p4573_p6 = por %p4572_p0, %p4571_p10 }
  0x53   : > { %p4574_p7 = pnand %p4573_p6, %p4567_p12 }
  0x55   : > { %4577 = shalt.err (!%p4574_p7)
}
  0x56   : > { %s6208_s4 = scalar_lea.sflag [#allocation7], %s5160_s30  ;;  %p4025_p13 = scmp.ge.s32.totalorder %s4930_s2, 1 }
  0x57   : > { %4355 = dma.hbm_to_vmem [thread:$0]  (!%p5155_p1), %s5166_s12, 128, %s5169_s18, %s6208_s4  }
  0x58   : > { %p768_p5 = scmp.lt.s32.totalorder %s4930_s2, 5  ;;  %s6210_s3 = sld [smem:[#allocation47_spill]] }
  0x59   : > { %s623_s17 = scalar_lea.vmem [#allocation9], %s5151_s15 }
  0x5a   : > { %p5209_p8 = pnand %p4025_p13, %p768_p5  ;;  %s630_s1 = sshll.u32 %s623_s17, 4  ;;  %s631_s1 = int_to_ptr.vmem [resolvable:$true] %s630_s1 }
  0x5c   : > { %s6209_s8 = scalar_select %p5209_p8, 1, 0 }
  0x5e   : > { %s5217_s11 = scalar_lea.hbm %s6210_s3, %s5148_s16  ;;  %s4583_s2 = scalar_lea.hbm %s6210_s3, 256 }
  0x5f   : > { %s4578_s12 = scalar_lea.hbm %s5217_s11, 128  ;;  %p4584_p9 = scmp.lt.u32.totalorder %s5217_s11, %s6210_s3 }
  0x60   : > { %p4579_p10 = scmp.ne.s32.totalorder %s5217_s11, %s4578_s12  ;;  %p4585_p11 = scmp.lt.u32.totalorder %s4583_s2, %s4578_s12 }
  0x61   : > { %p4587_p4 = scmp.lt.u32.totalorder %s4578_s12, %s5217_s11 }
  0x62   : > { %p4581_p12 = pnand %p4579_p10, %p5182_p3  ;;  %p4586_p2 = por %p4585_p11, %p4584_p9 }
  0x64   : > { %p4582_p0 = pneg %p4581_p12  ;;  %p4588_p6 = por %p4587_p4, %p4586_p2 }
  0x66   : > { %p4589_p7 = pnand %p4588_p6, %p4582_p0 }
  0x68   : > { %4592 = shalt.err (!%p4589_p7)
}
  0x69   : > { %s4593_s17 = scalar_lea.vmem %s631_s1, 128  ;;  %s4933_s13 = smov [#allocation9]  }
  0x6a   : > { %p4594_p13 = scmp.ne.s32.totalorder %s631_s1, %s4593_s17  ;;  %s4598_s28 = sshll.u32 %s4933_s13, 4  ;;  %s4599_s28 = int_to_ptr.vmem [resolvable:$false] %s4598_s28 }
  0x6b   : > { %s4600_s18 = scalar_lea.vmem %s4599_s28, 256  ;;  %p4601_p12 = scmp.lt.s32.totalorder %s631_s1, %s4599_s28 }
  0x6c   : > { %p4596_p5 = pnand %p4594_p13, %p5182_p3  ;;  %p4602_p8 = scmp.lt.s32.totalorder %s4600_s18, %s4593_s17 }
  0x6e   : > { %p4597_p10 = pneg %p4596_p5  ;;  %p4603_p1 = por %p4602_p8, %p4601_p12 }
  0x70   : > { %p4604_p9 = pnand %p4603_p1, %p4597_p10 }
  0x72   : > { %4607 = shalt.err (!%p4604_p9)
}
  0x73   : > { %p6211_p11 = scmp.ne.s32.totalorder %s6204_s24, 0  ;;  %s6212_s2 = scalar_lea.sflag [#allocation10], %s5160_s30 }
  0x74   : > { %s55_s13 = sadd.s32 1, %s4922_s21  ;;  %s195_s28 = sadd.s32 1, %s4898_s29 }
  0x75   : > { %4361 = dma.hbm_to_vmem [thread:$0]  (!%p6211_p11), %s5217_s11, 128, %s631_s1, %s6212_s2  }
  0x76   : > { %p56_p1 = scmp.ge.s32.totalorder %s55_s13, 2  ;;  %s5243_s12 = sand.u32 1, %s4898_s29  }
  0x77   : > { %s6148_s4 = sshll.u32 %s5243_s12, 4  ;;  %s6147_s25 = sshll.u32 %s4922_s21, 8 }
  0x78   : > { %s6285_s13 = smov (%p56_p1, %s55_s13), 0  ;;  %s6214_s26 = sadd.s32 1, %s4926_s22 }
  0x79   : > { %6213 = sst [smem:[#allocation40_spill]] %s6285_s13  ;;  %s6287_s26 = smov (!%p56_p1, %s6214_s26), %s4926_s22 }
  0x7a   : > { %s192_s11 = ssub.s32 %s4922_s21, %s6285_s13  ;;  %p60_p8 = scmp.ge.s32.totalorder %s6287_s26, 2 }
  0x7b   : > { %p193_p0 = scmp.eq.s32.totalorder %s192_s11, 0  ;;  %s6215_s6 = sld [smem:[#allocation50_spill]] }
  0x7c   : > { %s666_s2 = scalar_lea.vmem [#allocation12], %s6148_s4  ;;  %s6289_s26 = smov (%p60_p8, %s6287_s26), 0 }
  0x7d   : > { %s673_s3 = sshll.u32 %s666_s2, 4  ;;  %6216 = sst [smem:[#allocation41_spill]] %s6289_s26  ;;  %s5270_s3 = int_to_ptr.vmem [resolvable:$true] %s673_s3 }
  0x7e   : > { %s5266_s23 = scalar_select %p193_p0, %s4898_s29, %s195_s28  }
  0x7f   : > { %s62_s13 = ssub.s32 %s4926_s22, %s6289_s26  ;;  %s6218_s11 = sadd.s32 1, %s4910_s19 }
  0x80   : > { %6217 = sst [smem:[#allocation42_spill]] %s5266_s23  ;;  %p63_p2 = scmp.eq.s32.totalorder %s62_s13, 0 }
  0x81   : > { %s5259_s18 = scalar_lea.hbm %s6215_s6, %s6147_s25  ;;  %s663_s17 = scalar_lea.sflag [#allocation13], %s5160_s30 }
  0x82   : > { %s5275_s1 = scalar_select %p63_p2, %s4910_s19, %s6218_s11  }
  0x83   : > { %s4608_s25 = scalar_lea.hbm %s5259_s18, 256  ;;  %p6220_p6 = scmp.ne.s32.totalorder %s6206_s9, 0 }
  0x84   : > { %6219 = sst [smem:[#allocation43_spill]] %s5275_s1  ;;  %p4609_p4 = scmp.ne.s32.totalorder %s5259_s18, %s4608_s25 }
  0x85   : > { %p5282_p7 = pneg %p6220_p6  ;;  %s4613_s26 = scalar_lea.hbm %s6215_s6, 512 }
  0x86   : > { %p4614_p10 = scmp.lt.u32.totalorder %s5259_s18, %s6215_s6  ;;  %p4615_p12 = scmp.lt.u32.totalorder %s4613_s26, %s4608_s25 }
  0x87   : > { %s6221_s4 = scalar_select %p5282_p7, 1, 0 }
  0x88   : > { %p4611_p13 = pnand %p5282_p7, %p4609_p4  ;;  %p4616_p9 = por %p4615_p12, %p4614_p10 }
  0x89   : > { %p4617_p1 = scmp.lt.u32.totalorder %s4608_s25, %s5259_s18 }
  0x8a   : > { %p4612_p5 = pneg %p4611_p13 }
  0x8b   : > { %p4618_p8 = por %p4617_p1, %p4616_p9 }
  0x8d   : > { %p4619_p0 = pnand %p4618_p8, %p4612_p5 }
  0x8f   : > { %4622 = shalt.err (!%p4619_p0)
}
  0x90   : > { %s4623_s11 = scalar_lea.vmem %s5270_s3, 256  ;;  %s4934_s28 = smov [#allocation12]  }
  0x91   : > { %p4624_p2 = scmp.ne.s32.totalorder %s5270_s3, %s4623_s11  ;;  %s4628_s2 = sshll.u32 %s4934_s28, 4  ;;  %s4629_s2 = int_to_ptr.vmem [resolvable:$false] %s4628_s2 }
  0x92   : > { %s4630_s23 = scalar_lea.vmem %s4629_s2, 512  ;;  %p4631_p11 = scmp.lt.s32.totalorder %s5270_s3, %s4629_s2 }
  0x93   : > { %p4626_p4 = pnand %p4624_p2, %p5282_p7  ;;  %p4632_p3 = scmp.lt.s32.totalorder %s4630_s23, %s4623_s11 }
  0x95   : > { %p4627_p13 = pneg %p4626_p4  ;;  %p4633_p10 = por %p4632_p3, %p4631_p11 }
  0x97   : > { %p4634_p12 = pnand %p4633_p10, %p4627_p13 }
  0x99   : > { %4637 = shalt.err (!%p4634_p12)
}
  0x9a   : > { %s4935_s25 = smov 64   ;;  %s4936_s26 = smov 4  }
  0x9b   : > { %4367 = dma.hbm_to_vmem [thread:$0]  (!%p6220_p6), %s5259_s18, 256, %s5270_s3, %s663_s17, %s4935_s25, %s4935_s25, %s4936_s26  }
  0x9c   : > { %s6222_s28 = sld [smem:[#allocation44_spill]]  ;;  %s570_s6 = scalar_lea.vmem [#allocation3], %s5151_s15 }
  0x9d   : > { %s577_s1 = sshll.u32 %s570_s6, 4  ;;  %s4014_s19 = sshll.u32 %s4926_s22, 4  ;;  %s5317_s1 = int_to_ptr.vmem [resolvable:$true] %s577_s1 }
  0x9e   : > { %s567_s29 = scalar_lea.sflag [#allocation4], %s5145_s27  ;;  %p6224_p11 = scmp.ne.s32.totalorder %s6207_s14, 0 }
  0xa2   : > { %s6223_s23 = smov %s6222_s28  ;;  %s5314_s2 = scalar_lea.hbm %s6222_s28, %s5148_s16 }
  0xa3   : > { %s4638_s20 = scalar_lea.hbm %s5314_s2, 128  ;;  %s4643_s16 = scalar_lea.hbm %s6223_s23, 256 }
  0xa4   : > { %p4639_p3 = scmp.ne.s32.totalorder %s5314_s2, %s4638_s20  ;;  %p4644_p1 = scmp.lt.u32.totalorder %s5314_s2, %s6223_s23 }
  0xa5   : > { %p4645_p8 = scmp.lt.u32.totalorder %s4643_s16, %s4638_s20  ;;  %p4647_p2 = scmp.lt.u32.totalorder %s4638_s20, %s5314_s2 }
  0xa6   : > { %p4641_p5 = pnand %p4639_p3, %p6224_p11 }
  0xa7   : > { %p4646_p0 = por %p4645_p8, %p4644_p1 }
  0xa8   : > { %p4642_p9 = pneg %p4641_p5 }
  0xa9   : > { %p4648_p4 = por %p4647_p2, %p4646_p0 }
  0xab   : > { %p4649_p13 = pnand %p4648_p4, %p4642_p9 }
  0xad   : > { %4652 = shalt.err (!%p4649_p13)
}
  0xae   : > { %s4653_s6 = scalar_lea.vmem %s5317_s1, 128  ;;  %s4937_s15 = smov [#allocation3]  }
  0xaf   : > { %p4654_p10 = scmp.ne.s32.totalorder %s5317_s1, %s4653_s6  ;;  %s4658_s28 = sshll.u32 %s4937_s15, 4  ;;  %s4659_s28 = int_to_ptr.vmem [resolvable:$false] %s4658_s28 }
  0xb0   : > { %s4660_s3 = scalar_lea.vmem %s4659_s28, 256  ;;  %p4661_p5 = scmp.lt.s32.totalorder %s5317_s1, %s4659_s28 }
  0xb1   : > { %p4656_p12 = pnand %p4654_p10, %p6224_p11  ;;  %p4662_p6 = scmp.lt.s32.totalorder %s4660_s3, %s4653_s6 }
  0xb3   : > { %p4657_p3 = pneg %p4656_p12  ;;  %p4663_p1 = por %p4662_p6, %p4661_p5 }
  0xb5   : > { %p4664_p8 = pnand %p4663_p1, %p4657_p3 }
  0xb7   : > { %4667 = shalt.err (!%p4664_p8)
}
  0xb8   : > { %p6225_p9 = scmp.ne.s32.totalorder %s6204_s24, 0  ;;  %s6226_s16 = sld [smem:[#allocation46_spill]] }
  0xb9   : > { %s605_s11 = scalar_lea.vmem [#allocation8], %s5145_s27 }
  0xba   : > { %4352 = dma.hbm_to_vmem [thread:$0]  (!%p6225_p9), %s5314_s2, 128, %s5317_s1, %s567_s29  }
  0xbb   : > { %s612_s6 = sshll.u32 %s605_s11, 4  ;;  %s613_s6 = int_to_ptr.vmem [resolvable:$true] %s612_s6 }
  0xbe   : > { %s5347_s13 = scalar_lea.hbm %s6226_s16, %s4014_s19  ;;  %s4673_s1 = scalar_lea.hbm %s6226_s16, 32 }
  0xbf   : > { %s4668_s15 = scalar_lea.hbm %s5347_s13, 16  ;;  %p4674_p4 = scmp.lt.u32.totalorder %s5347_s13, %s6226_s16 }
  0xc0   : > { %p4669_p6 = scmp.ne.s32.totalorder %s5347_s13, %s4668_s15  ;;  %p4675_p13 = scmp.lt.u32.totalorder %s4673_s1, %s4668_s15 }
  0xc1   : > { %p4677_p12 = scmp.lt.u32.totalorder %s4668_s15, %s5347_s13 }
  0xc2   : > { %p4671_p0 = pnand %p4669_p6, %p6224_p11  ;;  %p4676_p10 = por %p4675_p13, %p4674_p4 }
  0xc4   : > { %p4672_p2 = pneg %p4671_p0  ;;  %p4678_p3 = por %p4677_p12, %p4676_p10 }
  0xc6   : > { %p4679_p5 = pnand %p4678_p3, %p4672_p2 }
  0xc8   : > { %4682 = shalt.err (!%p4679_p5)
}
  0xc9   : > { %s4683_s19 = scalar_lea.vmem %s613_s6, 16  ;;  %s4938_s27 = smov [#allocation8]  }
  0xca   : > { %p4684_p1 = scmp.ne.s32.totalorder %s613_s6, %s4683_s19  ;;  %s4688_s20 = sshll.u32 %s4938_s27, 4  ;;  %s4689_s20 = int_to_ptr.vmem [resolvable:$false] %s4688_s20 }
  0xcb   : > { %s4690_s18 = scalar_lea.vmem %s4689_s20, 32  ;;  %p4691_p0 = scmp.lt.s32.totalorder %s613_s6, %s4689_s20 }
  0xcc   : > { %p4686_p8 = pnand %p4684_p1, %p6224_p11  ;;  %p4692_p7 = scmp.lt.s32.totalorder %s4690_s18, %s4683_s19 }
  0xce   : > { %p4687_p6 = pneg %p4686_p8  ;;  %p4693_p9 = por %p4692_p7, %p4691_p0 }
  0xd0   : > { %p4694_p4 = pnand %p4693_p9, %p4687_p6 }
  0xd2   : > { %4697 = shalt.err (!%p4694_p4)
}
  0xd3   : > { %p6227_p13 = scmp.ne.s32.totalorder %s6204_s24, 0  ;;  %s6228_s11 = scalar_lea.sflag [#allocation7], %s5160_s30 }
  0xd4   : > { %s4017_s14 = sshll.u32 %s4922_s21, 4  ;;  %s648_s15 = scalar_lea.vmem [#allocation11], %s5243_s12 }
  0xd5   : > { %4358 = dma.hbm_to_vmem [thread:$0]  (!%p6227_p13), %s5347_s13, 16, %s613_s6, %s6228_s11  }
  0xd6   : > { %s655_s28 = sshll.u32 %s648_s15, 4  ;;  %s6229_s5 = sld [smem:[#allocation49_spill]]  ;;  %s656_s28 = int_to_ptr.vmem [resolvable:$true] %s655_s28 }
  0xd7   : > { %p6230_p11 = scmp.ne.s32.totalorder %s6221_s4, 0 }
  0xdc   : > { %s653_s2 = scalar_lea.hbm %s6229_s5, %s4017_s14  ;;  %s4703_s27 = scalar_lea.hbm %s6229_s5, 32 }
  0xdd   : > { %s4698_s3 = scalar_lea.hbm %s653_s2, 16  ;;  %p4704_p10 = scmp.lt.u32.totalorder %s653_s2, %s6229_s5 }
  0xde   : > { %p4699_p7 = scmp.ne.s32.totalorder %s653_s2, %s4698_s3  ;;  %p4705_p12 = scmp.lt.u32.totalorder %s4703_s27, %s4698_s3 }
  0xdf   : > { %p4707_p5 = scmp.lt.u32.totalorder %s4698_s3, %s653_s2 }
  0xe0   : > { %p4701_p9 = pnand %p4699_p7, %p6230_p11  ;;  %p4706_p3 = por %p4705_p12, %p4704_p10 }
  0xe2   : > { %p4702_p2 = pneg %p4701_p9  ;;  %p4708_p1 = por %p4707_p5, %p4706_p3 }
  0xe4   : > { %p4709_p8 = pnand %p4708_p1, %p4702_p2 }
  0xe6   : > { %4712 = shalt.err (!%p4709_p8)
}
  0xe7   : > { %s4713_s6 = scalar_lea.vmem %s656_s28, 16  ;;  %s4939_s18 = smov [#allocation11]  }
  0xe8   : > { %p4714_p6 = scmp.ne.s32.totalorder %s656_s28, %s4713_s6  ;;  %s4718_s11 = sshll.u32 %s4939_s18, 4  ;;  %s4719_s11 = int_to_ptr.vmem [resolvable:$false] %s4718_s11 }
  0xe9   : > { %s4720_s15 = scalar_lea.vmem %s4719_s11, 32  ;;  %p4721_p13 = scmp.lt.s32.totalorder %s656_s28, %s4719_s11 }
  0xea   : > { %p4716_p0 = pnand %p4714_p6, %p6230_p11  ;;  %p4722_p7 = scmp.lt.s32.totalorder %s4720_s15, %s4713_s6 }
  0xec   : > { %p4717_p4 = pneg %p4716_p0  ;;  %p4723_p9 = por %p4722_p7, %p4721_p13 }
  0xee   : > { %p4724_p10 = pnand %p4723_p9, %p4717_p4 }
  0xf0   : > { %4727 = shalt.err (!%p4724_p10)
}
  0xf1   : > { %p6231_p12 = scmp.ne.s32.totalorder %s6206_s9, 0  ;;  %s6232_s29 = scalar_lea.sflag [#allocation10], %s5160_s30 }
  0xf2   : > { %s6233_s7 = sld [smem:[#allocation51_spill]]  ;;  %s686_s19 = scalar_lea.vmem [#allocation14], %s5243_s12 }
  0xf3   : > { %4364 = dma.hbm_to_vmem [thread:$0]  (!%p6231_p12), %s653_s2, 16, %s656_s28, %s6232_s29  }
  0xf4   : > { %s693_s27 = sshll.u32 %s686_s19, 4  ;;  %s694_s27 = int_to_ptr.vmem [resolvable:$true] %s693_s27 }
  0xf8   : > { %s5395_s24 = scalar_lea.hbm %s6233_s7, %s4017_s14  ;;  %s4733_s2 = scalar_lea.hbm %s6233_s7, 32 }
  0xf9   : > { %s4728_s20 = scalar_lea.hbm %s5395_s24, 16  ;;  %p4734_p1 = scmp.lt.u32.totalorder %s5395_s24, %s6233_s7 }
  0xfa   : > { %p4729_p2 = scmp.ne.s32.totalorder %s5395_s24, %s4728_s20  ;;  %p4735_p8 = scmp.lt.u32.totalorder %s4733_s2, %s4728_s20 }
  0xfb   : > { %p4737_p0 = scmp.lt.u32.totalorder %s4728_s20, %s5395_s24 }
  0xfc   : > { %p4731_p3 = pnand %p4729_p2, %p6230_p11  ;;  %p4736_p6 = por %p4735_p8, %p4734_p1 }
  0xfe   : > { %p4732_p5 = pneg %p4731_p3  ;;  %p4738_p4 = por %p4737_p0, %p4736_p6 }
 0x100   : > { %p4739_p13 = pnand %p4738_p4, %p4732_p5 }
 0x102   : > { %4742 = shalt.err (!%p4739_p13)
}
 0x103   : > { %s4743_s14 = scalar_lea.vmem %s694_s27, 16  ;;  %s4940_s11 = smov [#allocation14]  }
 0x104   : > { %p4744_p7 = scmp.ne.s32.totalorder %s694_s27, %s4743_s14  ;;  %s4748_s15 = sshll.u32 %s4940_s11, 4  ;;  %s4749_s15 = int_to_ptr.vmem [resolvable:$false] %s4748_s15 }
 0x105   : > { %s4750_s29 = scalar_lea.vmem %s4749_s15, 32  ;;  %p4751_p2 = scmp.lt.s32.totalorder %s694_s27, %s4749_s15 }
 0x106   : > { %p4746_p9 = pnand %p4744_p7, %p6230_p11  ;;  %p4752_p3 = scmp.lt.s32.totalorder %s4750_s29, %s4743_s14 }
 0x108   : > { %p4747_p10 = pneg %p4746_p9  ;;  %p4753_p12 = por %p4752_p3, %p4751_p2 }
 0x10a   : > { %p4754_p1 = pnand %p4753_p12, %p4747_p10 }
 0x10c   : > { %4757 = shalt.err (!%p4754_p1)
}
 0x10d   : > { %p6234_p8 = scmp.ne.s32.totalorder %s6206_s9, 0  ;;  %s6235_s1 = sshll.u32 %s4922_s21, 8 }
 0x10e   : > { %s6236_s10 = sld [smem:[#allocation54_spill]]  ;;  %s6237_s13 = sshll.u32 %s5243_s12, 4 }
 0x10f   : > { %4370 = dma.hbm_to_vmem [thread:$0]  (!%p6234_p8), %s5395_s24, 16, %s694_s27, %s663_s17  }
 0x110   : > { %s719_s28 = scalar_lea.vmem [#allocation15], %s6237_s13  ;;  %s716_s30 = scalar_lea.sflag [#allocation16], %s5243_s12 }
 0x111   : > { %s726_s2 = sshll.u32 %s719_s28, 4  ;;  %s5426_s2 = int_to_ptr.vmem [resolvable:$true] %s726_s2 }
 0x114   : > { %s5422_s20 = scalar_lea.hbm %s6236_s10, %s6235_s1  ;;  %s4763_s27 = scalar_lea.hbm %s6236_s10, 512 }
 0x115   : > { %s4758_s6 = scalar_lea.hbm %s5422_s20, 256  ;;  %p4764_p0 = scmp.lt.u32.totalorder %s5422_s20, %s6236_s10 }
 0x116   : > { %p4759_p12 = scmp.ne.s32.totalorder %s5422_s20, %s4758_s6  ;;  %p4765_p4 = scmp.lt.u32.totalorder %s4763_s27, %s4758_s6 }
 0x117   : > { %p4767_p7 = scmp.lt.u32.totalorder %s4758_s6, %s5422_s20 }
 0x118   : > { %p4761_p5 = pnand %p4759_p12, %p6230_p11  ;;  %p4766_p13 = por %p4765_p4, %p4764_p0 }
 0x11a   : > { %p4762_p6 = pneg %p4761_p5  ;;  %p4768_p9 = por %p4767_p7, %p4766_p13 }
 0x11c   : > { %p4769_p10 = pnand %p4768_p9, %p4762_p6 }
 0x11e   : > { %4772 = shalt.err (!%p4769_p10)
}
 0x11f   : > { %s4773_s11 = scalar_lea.vmem %s5426_s2, 256  ;;  %s4941_s15 = smov [#allocation15]  }
 0x120   : > { %p4774_p2 = scmp.ne.s32.totalorder %s5426_s2, %s4773_s11  ;;  %s4778_s29 = sshll.u32 %s4941_s15, 4  ;;  %s4779_s29 = int_to_ptr.vmem [resolvable:$false] %s4778_s29 }
 0x121   : > { %s4780_s1 = scalar_lea.vmem %s4779_s29, 512  ;;  %p4781_p12 = scmp.lt.s32.totalorder %s5426_s2, %s4779_s29 }
 0x122   : > { %p4776_p3 = pnand %p4774_p2, %p6230_p11  ;;  %p4782_p5 = scmp.lt.s32.totalorder %s4780_s1, %s4773_s11 }
 0x124   : > { %p4777_p1 = pneg %p4776_p3  ;;  %p4783_p0 = por %p4782_p5, %p4781_p12 }
 0x126   : > { %p4784_p4 = pnand %p4783_p0, %p4777_p1 }
 0x128   : > { %4787 = shalt.err (!%p4784_p4)
}
 0x129   : > { %4373 = dma.hbm_to_vmem [thread:$0]  (!%p6234_p8), %s5422_s20, 256, %s5426_s2, %s716_s30, %s4935_s25, %s4935_s25, %s4936_s26  }
 0x12a   : > { %p6238_p11 = scmp.ne.s32.totalorder %s6209_s8, 0 }
 0x12b   : > { %s6239_s4 = sld [smem:[#allocation36_spill]] (!%p6238_p11)  ;;  %s5458_s3 = sand.u32 (!%p6238_p11), 1, %s4906_s0  }
 0x12c   : > { %772 = sbr.rel (%p6238_p11) target bundleno = 5274 (0x149a), region = 92  ;;  %s5461_s19 = sshll.u32 (!%p6238_p11), %s5458_s3, 3 }
 0x12d   : > { %s775_s9 = scalar_lea.sflag (!%p6238_p11), [#allocation4], %s5458_s3 }
 0x131   : > { %p6240_p6 = scmp.ne.s32.totalorder (!%p6238_p11), %s6239_s4, 0 }
 0x133   : > { %4861 = dma.done.wait (%p6240_p6), %s775_s9, 128  }
 0x134   : > { %4863 = vsyncadd (%p6240_p6), %s775_s9, 4294967168  ;;  %s6241_s12 = sld [smem:[#allocation35_spill]] }
 0x13a   : > { %s783_s8 = sand.u32 1, %s6241_s12  }
 0x13b   : > { %s784_s25 = scalar_lea.sflag [#allocation7], %s783_s8 }
 0x13c   : > { %4865 = dma.done.wait (%p6240_p6), %s784_s25, 144  }
 0x13d   : > { %4867 = vsyncadd (%p6240_p6), %s784_s25, 4294967152  ;;  %s801_s28 = scalar_lea.sflag [#allocation10], %s783_s8 }
 0x13e   : > { %4869 = dma.done.wait (%p6240_p6), %s801_s28, 128  }
 0x13f   : > { %4871 = vsyncadd (%p6240_p6), %s801_s28, 4294967168  ;;  %s6242_s30 = sld [smem:[#allocation25_spill]] }
 0x140   : > { %s6243_s6 = sld [smem:[#allocation37_spill]] }
 0x145   : > { %s5482_s17 = sand.u32 1, %s6242_s30  }
 0x146   : > { %p6244_p8 = scmp.ne.s32.totalorder %s6243_s6, 0 }
 0x148   : > { %4873 = dma.done.wait (%p6244_p8), %s801_s28, 16  }
 0x149   : > { %4875 = vsyncadd (%p6244_p8), %s801_s28, 4294967280  ;;  %s4029_s27 = sshll.u32 %s5482_s17, 4  ;;  %s818_s18 = scalar_lea.sflag [#allocation13], %s783_s8 }
 0x14a   : > { %s5490_s14 = scalar_lea.vmem [#allocation12], %s4029_s27 }
 0x14b   : > { %4877 = dma.done.wait (%p6244_p8), %s818_s18, 272  }
 0x14c   : > { %4879 = vsyncadd (%p6244_p8), %s818_s18, 4294967024  ;;  %s835_s15 = scalar_lea.sflag [#allocation16], %s5482_s17  ;;  %s5498_s29 = scalar_lea.vmem [#allocation15], %s4029_s27 }
 0x14d   : > { %4881 = dma.done.wait (%p6244_p8), %s835_s15, 256  }
 0x14e   : > { %4883 = vsyncadd (%p6244_p8), %s835_s15, 4294967040  ;;  %s6245_s1 = sld [smem:[#allocation30_spill]]  ;;  %s6246_s28 = sld [smem:[#allocation48_spill]] }
 0x14f   : > { %s6247_s15 = sld [smem:[#allocation52_spill]]  ;;  %s6248_s2 = sld [smem:[#allocation53_spill]] }
 0x150   : > { %s6249_s7 = sld [smem:[#allocation55_spill]]  ;;  %s6250_s10 = sld [smem:[#allocation56_spill]] }
 0x151   : > { %s6251_s23 = sld [smem:[#allocation57_spill]]  ;;  %s6252_s21 = sld [smem:[#allocation58_spill]] }
 0x152   : > { %s6253_s11 = sld [smem:[#allocation59_spill]] }
 0x154   : > { %p956_p13 = scmp.lt.s32.totalorder %s6245_s1, 1  ;;  %p4040_p7 = scmp.ne.s32.totalorder %s6245_s1, 0 }
 0x155   : > { %vm995_vm0 = vcmask (!%p4040_p7), 261120  }
 0x156   : > { %s5506_s4 = scalar_select %p956_p13, %s6245_s1, 1 }
 0x158   : > { %s4117_s9 = sshll.u32 %s5506_s4, 4  ;;  %s4330_s12 = smul.u32 48, %s5506_s4 }
 0x159   : > { %s5513_s30 = scalar_lea.vmem %s6246_s28, %s4117_s9  ;;  %s5516_s6 = sshll.u32 %s5506_s4, 2 }
 0x15a   : > { %s5521_s20 = scalar_lea.vmem %s6247_s15, %s4330_s12  ;;  %s969_s24 = scalar_lea.vmem %s6248_s2, %s5516_s6 }
 0x15b   : > { %s972_s8 = scalar_lea.vmem %s6249_s7, %s5506_s4  ;;  %s4118_s9 = sshll.u32 %s5506_s4, 5 }
 0x15c   : > { %s5535_s16 = scalar_lea.vmem %s6250_s10, %s4118_s9  ;;  %s980_s22 = scalar_lea.vmem %s6251_s23, %s5506_s4 }
 0x15d   : > { %s5545_s0 = scalar_lea.vmem %s6252_s21, %s5516_s6  ;;  %s5551_s5 = scalar_lea.vmem %s6253_s11, %s5516_s6 }
 0x15e   : > { %s955_s7 = scalar_lea.vmem [#allocation17], %s5461_s19  ;;  %993 = sbr.rel (%p4040_p7) target bundleno = 357 (0x165), region = 128 }
 0x15f   : > { %s6254_s10 = scalar_lea.vmem (!%p4040_p7), [#allocation3], %s5461_s19 }
 0x160   : > { %v994_v0 = vld [vmem:[%s6254_s10] sm:$0xff] (!%p4040_p7) }
 0x161   : > { %996 = vst.msk [vmem:[#allocation2] sm:$0xff] (!%p4040_p7), %vm995_vm0, %v994_v0 }
 0x165 PF: > { %vm1009_vm1 = vcmask 261120   ;;  %v4482_v8 = vld [vmem:[%s5513_s30] sm:$0xff]   ;;  %v4942_v9 = vmov 0.0   ;;  %vm4943_vm2 = vmmov 0   ;;  %v4483_v10 = vld [vmem:[%s5513_s30 + $0x8] sm:$0xff]   ;;  %v1021_v14 = vlaneseq  ;;  %s6255_s21 = scalar_lea.vmem [#allocation11], %s5482_s17 }
 0x166   : > { %4174 = vmatprep.subr.bf16.mxu1 %v4942_v9  ;;  %4178 = vmatprep.mubr.msk.bf16.mxu1 %vm4943_vm2, %v4942_v9  ;;  %v5579_v22 = vld [vmem:[%s5545_s0] sm:$0x7]  ;;  %s4944_s23 = smov 104   ;;  %s4945_s13 = smov 120   ;;  %v4948_v40 = vmov 1983009808  }
 0x167   : > { %4175 = vmatpush3.bf16.msra.mxu1 %v4482_v8  ;;  %4188 = vmatprep.subr.bf16.mxu0 %v4942_v9  ;;  %v5573_v18 = vshrl.u32 %v1021_v14, 7  ;;  %v5584_v24 = vld [vmem:[%s5551_s5] sm:$0x7]  ;;  %s4946_s1 = smov 112   ;;  %s4947_s30 = smov 96   ;;  %v1121_v41 = vunpack.c.l.s4 %v4948_v40  ;;  %vm1562_vm5 = vcmask 64512  }
 0x168   : > { %v5557_v1 = vld [vmem:[#allocation2] sm:$0xff]  ;;  %4176 = vmatprep.subr.bf16.mxu1 %v4942_v9  ;;  %4190 = vmatprep.mubr.msk.bf16.mxu0 %vm4943_vm2, %v4942_v9  ;;  %v4949_v44 = vmov 1934713408   ;;  %s6256_s9 = scalar_lea.vmem [#allocation9], %s5461_s19  ;;  %s4950_s25 = smov 64   ;;  %vm1798_vm7 = vcmask 1043456  }
 0x169   : > { %v1010_v2 = vsel %vm1009_vm1, %v5557_v1, 0.0  ;;  %v5576_v21 = vsub.s32 0, %v5573_v18  ;;  %v4041_v31 = vld [vmem:[%s6255_s21] ss:$0 sm:$0xff]  ;;  %v1122_v42 = vunpack.c.0.s8 %v1121_v41  ;;  %v1153_v45 = vunpack.c.l.s4 %v4949_v44  ;;  %s4951_s28 = smov 16   ;;  %s4952_s27 = smov 8  }
 0x16a   : > { %1011 = vadd.xlane.f32.xlu0 %v1010_v2  ;;  %s4953_s18 = smov 24   ;;  %vm2129_vm8 = vcmask 130048   ;;  %vm2131_vm9 = vcmask 195584   ;;  %vm3583_vm15 = vcmask 523264  }
 0x16b   : > { %4177 = vmatpush3.bf16.msra.mxu1 %v4483_v10  ;;  %v1024_v23 = vrot.slane %v5579_v22, %v5576_v21  ;;  %v1039_v26 = vrot.slane %v5584_v24, %v5576_v21  ;;  %v5620_v48 = vsub.s32 %v1122_v42, %v5573_v18  ;;  %v1154_v52 = vunpack.c.0.s8 %v1153_v45 }
 0x16c   : > { %4182 = vmatprep.subr.bf16.mxu1 %v4942_v9 }
 0x16d   : > { %v5631_v58 = vsub.s32 %v1154_v52, %v5573_v18 }
 0x1f7   : > { %v1012_v3 = vpop.xlane.xlu0 %1011 }
 0x1f8   : > { %v1014_v4 = vmul.f32 0.03125, %v1012_v3 }
 0x1fa   : > { %v1015_v5 = vsub.f32 %v5557_v1, %v1014_v4 }
 0x1fc   : > { %v1016_v6 = vmul.f32 %v1015_v5, %v1015_v5  ;;  %v1025_v25 = vmul.f32 %v1024_v23, %v1015_v5 }
 0x1fe   : > { %v1017_v7 = vsel %vm1009_vm1, %v1016_v6, 0.0 }
 0x1ff   : > { %1018 = vadd.xlane.f32.xlu0 %v1017_v7 }
 0x28c   : > { %v1019_v11 = vpop.xlane.xlu0 %1018 }
 0x28d   : > { %v1020_v12 = vmul.f32 0.032258064, %v1019_v11 }
 0x28f   : > { %4498 = vrsqrt.f32 %v1020_v12  ;;  %vm1028_vm3 = vcmp.eq.f32.partialorder %v1020_v12, inf  ;;  %v1031_v16 = vand.u32 2147483648, %v1020_v12  ;;  %vm1030_vm4 = vcmp.eq.f32.partialorder %v1020_v12, 0.0 }
 0x299   : > { %v4499_v13 = vpop.eup %4498 }
 0x29a   : > { %v1027_v15 = vmul.f32 %v4499_v13, %v1020_v12 }
 0x29c   : > { %v1029_v17 = vsel %vm1028_vm3, %v1020_v12, %v1027_v15 }
 0x29d   : > { %v1032_v19 = vsel %vm1030_vm4, %v1031_v16, %v1029_v17 }
 0x29e   : > { %v1033_v20 = vadd.f32 1e-06, %v1032_v19 }
 0x2a0   : > { %4500 = vrcp.f32 %v1033_v20 }
 0x2aa   : > { %v4501_v27 = vpop.eup %4500 }
 0x2ab   : > { %v1035_v28 = vmul.f32 %v4501_v27, %v1025_v25 }
 0x2ad   : > { %v1040_v29 = vadd.f32 %v1039_v26, %v1035_v28 }
 0x2af   : > { %v1041_v30 = vpack.c.bf16 %v1040_v29, %v1040_v29 }
 0x2b1   : > { %4179 = vmatmul.mubr.msk.bf16.vlgmr.msra.gmra.mrb[0].mxu1 %vm1009_vm1, %v1041_v30 }
 0x2b2   : > { %4184 = vmatprep.mubr.msk.bf16.mxu1 %vm4943_vm2, %v4942_v9 }
 0x384   : > { %v1102_v32 = vpop.f32.mrb[0].mxu1 }
 0x385   : > { %v5593_v33 = vadd.f32 %v4041_v31, %v1102_v32  ;;  %v4180_v34 = vpop.f32.mrb[1].mxu1 }
 0x386   : > { %v1105_v35 = vpop.f32.mrb[2].mxu1 }
 0x387   : > { %1115 = vrot.lane.b32.xlu0 %v5593_v33, %s4944_s23  ;;  %1109 = vrot.lane.b32.xlu1 %v5593_v33, %s4945_s13  ;;  %v4181_v36 = vpop.f32.mrb[3].mxu1 }
 0x38b   : > { %1112 = vrot.lane.b32.xlu1 %v5593_v33, %s4946_s1 }
 0x38f   : > { %1258 = vrot.lane.b32.xlu1 %v5593_v33, %s4947_s30 }
 0x3f9   : > { %v5603_v37 = vpop.permute.xlu1 %1109  ;;  %v5611_v39 = vpop.permute.xlu0 %1115 }
 0x3fa   : > { %1260 = vrot.lane.b32.xlu1 %v5603_v37, %s4947_s30  ;;  %v1134_v49 = vcombine.low %v5603_v37, %v5611_v39  ;;  %v1135_v50 = vcombine.high %v5603_v37, %v5611_v39 }
 0x3fc   : > { %v1142_v55 = vrot.slane %v1134_v49, %v5620_v48  ;;  %v1149_v56 = vrot.slane %v1135_v50, %v5620_v48 }
 0x3fd   : > { %v5607_v38 = vpop.permute.xlu1 %1112 }
 0x3fe   : > { %1262 = vrot.lane.b32.xlu1 %v5607_v38, %s4947_s30  ;;  %v1118_v46 = vcombine.low %v5593_v33, %v5607_v38  ;;  %v1119_v47 = vcombine.high %v5593_v33, %v5607_v38 }
 0x400   : > { %v1126_v53 = vrot.slane %v1118_v46, %v5620_v48  ;;  %v1133_v54 = vrot.slane %v1119_v47, %v5620_v48 }
 0x401   : > { %v1259_v43 = vpop.permute.xlu1 %1258 }
 0x402   : > { %1264 = vrot.lane.b32.xlu1 %v5611_v39, %s4947_s30  ;;  %v1150_v59 = vcombine.low %v1126_v53, %v1142_v55  ;;  %v1151_v60 = vcombine.high %v1126_v53, %v1142_v55  ;;  %v1166_v61 = vcombine.low %v1133_v54, %v1149_v56  ;;  %v1167_v62 = vcombine.high %v1133_v54, %v1149_v56 }
 0x404   : > { %v1158_v5 = vrot.slane %v1150_v59, %v5631_v58  ;;  %v1165_v6 = vrot.slane %v1151_v60, %v5631_v58  ;;  %v1174_v7 = vrot.slane %v1166_v61, %v5631_v58  ;;  %v1181_v8 = vrot.slane %v1167_v62, %v5631_v58 }
 0x406   : > { %v1186_v19 = vcombine.low %v1158_v5, %v1165_v6  ;;  %v4045_v20 = vcombine.high %v1158_v5, %v1165_v6  ;;  %v1202_v23 = vcombine.low %v1174_v7, %v1181_v8  ;;  %v4046_v25 = vcombine.high %v1174_v7, %v1181_v8 }
 0x408   : > { %v1193_v35 = vrot.slane %v1186_v19, %v5620_v48  ;;  %v1201_v36 = vrot.slane %v4045_v20, %v5620_v48  ;;  %v1209_v40 = vrot.slane %v1202_v23, %v5620_v48  ;;  %v1217_v41 = vrot.slane %v4046_v25, %v5620_v48 }
 0x40a   : > { %v1218_v53 = vcombine.low %v1193_v35, %v1201_v36  ;;  %v1234_v54 = vcombine.low %v1209_v40, %v1217_v41  ;;  %v1219_v5 = vcombine.high %v1193_v35, %v1201_v36  ;;  %v1235_v8 = vcombine.high %v1209_v40, %v1217_v41 }
 0x40c   : > { %v1226_v62 = vrot.slane %v1218_v53, %v5631_v58 }
 0x46c   : > { %v1261_v51 = vpop.permute.xlu1 %1260 }
 0x470   : > { %v1263_v57 = vpop.permute.xlu1 %1262 }
 0x471   : > { %v1270_v63 = vcombine.low %v1259_v43, %v1263_v57  ;;  %v1271_v0 = vcombine.high %v1259_v43, %v1263_v57 }
 0x473   : > { %v1278_v10 = vrot.slane %v1270_v63, %v5620_v48  ;;  %v1285_v11 = vrot.slane %v1271_v0, %v5620_v48  ;;  %v1242_v63 = vrot.slane %v1234_v54, %v5631_v58 }
 0x474   : > { %v1265_v2 = vpop.permute.xlu1 %1264 }
 0x475   : > { %v1286_v3 = vcombine.low %v1261_v51, %v1265_v2  ;;  %v1287_v4 = vcombine.high %v1261_v51, %v1265_v2  ;;  %v1250_v6 = vcombine.low %v1226_v62, %v1242_v63  ;;  %v1251_v7 = vcombine.high %v1226_v62, %v1242_v63 }
 0x477   : > { %v1294_v12 = vrot.slane %v1286_v3, %v5620_v48  ;;  %v1301_v13 = vrot.slane %v1287_v4, %v5620_v48 }
 0x479   : > { %v1302_v14 = vcombine.low %v1278_v10, %v1294_v12  ;;  %v1303_v15 = vcombine.high %v1278_v10, %v1294_v12  ;;  %v1318_v16 = vcombine.low %v1285_v11, %v1301_v13  ;;  %v1319_v17 = vcombine.high %v1285_v11, %v1301_v13 }
 0x47a   : > { %v1254_v12 = vpack.c.bf16 %v1250_v6, %v1250_v6  ;;  %v1255_v13 = vpack.c.bf16 %v1251_v7, %v1251_v7 }
 0x47b   : > { %v1310_v26 = vrot.slane %v1302_v14, %v5631_v58  ;;  %v1317_v27 = vrot.slane %v1303_v15, %v5631_v58  ;;  %v1326_v28 = vrot.slane %v1318_v16, %v5631_v58  ;;  %v1333_v29 = vrot.slane %v1319_v17, %v5631_v58 }
 0x47c   : > { %v1233_v14 = vrot.slane %v1219_v5, %v5631_v58  ;;  %v1249_v15 = vrot.slane %v1235_v8, %v5631_v58 }
 0x47d   : > { %v1338_v30 = vcombine.low %v1310_v26, %v1317_v27  ;;  %v4047_v31 = vcombine.high %v1310_v26, %v1317_v27  ;;  %v1354_v32 = vcombine.low %v1326_v28, %v1333_v29  ;;  %v4048_v34 = vcombine.high %v1326_v28, %v1333_v29  ;;  %v1000_v26 = vld [vmem:[%s6256_s9] sm:$0xff] }
 0x47e   : > { %v1252_v19 = vcombine.low %v1233_v14, %v1249_v15  ;;  %v1253_v20 = vcombine.high %v1233_v14, %v1249_v15  ;;  %vm1001_vm6 = vcmp.eq.f32.partialorder %v1000_v26, 0.0 }
 0x47f   : > { %v1345_v42 = vrot.slane %v1338_v30, %v5620_v48  ;;  %v1353_v43 = vrot.slane %v4047_v31, %v5620_v48  ;;  %v1361_v44 = vrot.slane %v1354_v32, %v5620_v48  ;;  %v1369_v45 = vrot.slane %v4048_v34, %v5620_v48 }
 0x480   : > { %v1256_v23 = vpack.c.bf16 %v1252_v19, %v1252_v19  ;;  %v1257_v25 = vpack.c.bf16 %v1253_v20, %v1253_v20  ;;  %v1002_v27 = vsel %vm1001_vm6, -1e+09, %v4942_v9 }
 0x481   : > { %v1370_v46 = vcombine.low %v1345_v42, %v1353_v43  ;;  %v1386_v47 = vcombine.low %v1361_v44, %v1369_v45  ;;  %v1371_v49 = vcombine.high %v1345_v42, %v1353_v43  ;;  %v1387_v50 = vcombine.high %v1361_v44, %v1369_v45 }
 0x483   : > { %v1378_v51 = vrot.slane %v1370_v46, %v5631_v58  ;;  %v1394_v52 = vrot.slane %v1386_v47, %v5631_v58  ;;  %v1385_v57 = vrot.slane %v1371_v49, %v5631_v58  ;;  %v1401_v59 = vrot.slane %v1387_v50, %v5631_v58 }
 0x485   : > { %v1402_v55 = vcombine.low %v1378_v51, %v1394_v52  ;;  %v1403_v56 = vcombine.high %v1378_v51, %v1394_v52  ;;  %v1404_v3 = vcombine.low %v1385_v57, %v1401_v59  ;;  %v1405_v4 = vcombine.high %v1385_v57, %v1401_v59 }
 0x487   : > { %v1406_v60 = vpack.c.bf16 %v1402_v55, %v1402_v55  ;;  %v1407_v61 = vpack.c.bf16 %v1403_v56, %v1403_v56  ;;  %v1408_v10 = vpack.c.bf16 %v1404_v3, %v1404_v3  ;;  %v1409_v11 = vpack.c.bf16 %v1405_v4, %v1405_v4 }
 0x489   : > { %v1567_v0 = vsel %vm1562_vm5, %v1406_v60, 0  ;;  %v1613_v2 = vsel %vm1562_vm5, %v1407_v61, 0  ;;  %v1659_v16 = vsel %vm1562_vm5, %v1408_v10, 0  ;;  %v1705_v17 = vsel %vm1562_vm5, %v1409_v11, 0 }
 0x48a   : > { %4183 = vmatpush3.bf16.xpose.msra.mxu1 %v1567_v0  ;;  %4189 = vmatpush3.bf16.xpose.msra.mxu0 %v1613_v2 }
 0x48b   : > { %4194 = vmatprep.subr.bf16.mxu1 %v4942_v9  ;;  %4200 = vmatprep.subr.bf16.mxu0 %v4942_v9 }
 0x491   : > { %4185 = vmatmul.mubr.msk.bf16.vlgmr.msra.gmra.mrb[4].mxu1 %vm1562_vm5, %v1254_v12  ;;  %4191 = vmatmul.mubr.msk.bf16.vlgmr.msra.gmra.mrb[0].mxu0 %vm1562_vm5, %v1255_v13 }
 0x492   : > { %4195 = vmatpush3.bf16.xpose.msra.mxu1 %v1659_v16  ;;  %4201 = vmatpush3.bf16.xpose.msra.mxu0 %v1705_v17 }
 0x493   : > { %4196 = vmatprep.mubr.msk.bf16.mxu1 %vm4943_vm2, %v4942_v9  ;;  %4202 = vmatprep.mubr.msk.bf16.mxu0 %vm4943_vm2, %v4942_v9 }
 0x494   : > { %4206 = vmatprep.subr.bf16.mxu1 %v4942_v9  ;;  %4212 = vmatprep.subr.bf16.mxu0 %v4942_v9 }
 0x499   : > { %4197 = vmatmul.mubr.msk.bf16.vlgmr.msra.gmra.mrb[8].mxu1 %vm1562_vm5, %v1256_v23  ;;  %4203 = vmatmul.mubr.msk.bf16.vlgmr.msra.gmra.mrb[4].mxu0 %vm1562_vm5, %v1257_v25 }
 0x49a   : > { %4208 = vmatprep.mubr.msk.bf16.mxu1 %vm4943_vm2, %v4942_v9  ;;  %4214 = vmatprep.mubr.msk.bf16.mxu0 %vm4943_vm2, %v4942_v9 }
 0x564   : > { %v1603_v28 = vpop.f32.mrb[4].mxu1  ;;  %v1649_v29 = vpop.f32.mrb[0].mxu0 }
 0x565   : > { %v1604_v30 = vadd.f32 %v1603_v28, %v1002_v27  ;;  %v1650_v31 = vadd.f32 %v1649_v29, %v1002_v27  ;;  %v4186_v32 = vpop.f32.mrb[5].mxu1  ;;  %v4192_v34 = vpop.f32.mrb[1].mxu0 }
 0x566   : > { %v1606_v35 = vpop.f32.mrb[6].mxu1  ;;  %v1652_v36 = vpop.f32.mrb[2].mxu0 }
 0x567   : > { %v4187_v40 = vpop.f32.mrb[7].mxu1  ;;  %v4193_v41 = vpop.f32.mrb[3].mxu0  ;;  %v1750_v42 = vsel %vm1562_vm5, %v1650_v31, -inf  ;;  %v1747_v43 = vsel %vm1562_vm5, %v1604_v30, -inf }
 0x568   : > { %1751 = vmax.xlane.f32.xlu0 %v1750_v42  ;;  %1748 = vmax.xlane.f32.xlu1 %v1747_v43 }
 0x56c   : > { %v1695_v44 = vpop.f32.mrb[8].mxu1  ;;  %v1741_v45 = vpop.f32.mrb[4].mxu0 }
 0x56d   : > { %v1696_v46 = vadd.f32 %v1695_v44, %v1002_v27  ;;  %v1742_v47 = vadd.f32 %v1741_v45, %v1002_v27  ;;  %v4198_v49 = vpop.f32.mrb[9].mxu1  ;;  %v4204_v50 = vpop.f32.mrb[5].mxu0 }
 0x56e   : > { %v1698_v51 = vpop.f32.mrb[10].mxu1  ;;  %v1744_v52 = vpop.f32.mrb[6].mxu0 }
 0x56f   : > { %v4199_v53 = vpop.f32.mrb[11].mxu1  ;;  %v4205_v54 = vpop.f32.mrb[7].mxu0  ;;  %v1756_v55 = vsel %vm1562_vm5, %v1742_v47, -inf  ;;  %v1753_v56 = vsel %vm1562_vm5, %v1696_v46, -inf }
 0x570   : > { %1757 = vmax.xlane.f32.xlu0 %v1756_v55  ;;  %1754 = vmax.xlane.f32.xlu1 %v1753_v56 }
 0x581   : > { %1410 = vrot.lane.b32.xlu1 %v5593_v33, %s4950_s25 }
 0x5f5   : > { %v1752_v57 = vpop.xlane.xlu0 %1751  ;;  %v1749_v59 = vpop.xlane.xlu1 %1748 }
 0x5f6   : > { %v1760_v60 = vsub.f32 %v1650_v31, %v1752_v57  ;;  %v1759_v61 = vsub.f32 %v1604_v30, %v1749_v59 }
 0x5f8   : > { %v1765_v62 = vmul.f32 1.442695, %v1760_v60  ;;  %v1763_v63 = vmul.f32 1.442695, %v1759_v61 }
 0x5fa   : > { %4502 = vpow2.f32 %v1765_v62 }
 0x5fb   : > { %4504 = vpow2.f32 %v1763_v63 }
 0x5fd   : > { %v1755_v33 = vpop.xlane.xlu1 %1754  ;;  %v1758_v6 = vpop.xlane.xlu0 %1757 }
 0x5fe   : > { %v1761_v5 = vsub.f32 %v1696_v46, %v1755_v33  ;;  %v1762_v8 = vsub.f32 %v1742_v47, %v1758_v6 }
 0x600   : > { %v1767_v7 = vmul.f32 1.442695, %v1761_v5  ;;  %v1769_v10 = vmul.f32 1.442695, %v1762_v8 }
 0x602   : > { %4506 = vpow2.f32 %v1767_v7 }
 0x603   : > { %4508 = vpow2.f32 %v1769_v10 }
 0x604   : > { %v5689_v0 = vpop.eup %4502 }
 0x605   : > { %v5691_v2 = vpop.eup %4504  ;;  %v1774_v3 = vsel %vm1562_vm5, %v5689_v0, 0.0 }
 0x606   : > { %1775 = vadd.xlane.f32.xlu0 %v1774_v3  ;;  %v1771_v4 = vsel %vm1562_vm5, %v5691_v2, 0.0 }
 0x607   : > { %1772 = vadd.xlane.f32.xlu1 %v1771_v4 }
 0x60c   : > { %v5700_v11 = vpop.eup %4506 }
 0x60d   : > { %v1777_v12 = vsel %vm1562_vm5, %v5700_v11, 0.0  ;;  %v5704_v13 = vpop.eup %4508 }
 0x618   : > { %1414 = vrot.lane.b32.xlu1 %v5607_v38, %s4950_s25  ;;  %v1780_v38 = vsel %vm1562_vm5, %v5704_v13, 0.0 }
 0x61c   : > { %1416 = vrot.lane.b32.xlu1 %v5611_v39, %s4950_s25  ;;  %1412 = vrot.lane.b32.xlu0 %v5603_v37, %s4950_s25  ;;  %v1411_v37 = vpop.permute.xlu1 %1410 }
 0x63b   : > { %1778 = vadd.xlane.f32.xlu0 %v1777_v12 }
 0x640   : > { %1781 = vadd.xlane.f32.xlu1 %v1780_v38 }
 0x693   : > { %v1776_v14 = vpop.xlane.xlu0 %1775 }
 0x694   : > { %v1773_v39 = vpop.xlane.xlu1 %1772  ;;  %4510 = vrcp.f32 %v1776_v14 }
 0x695   : > { %4512 = vrcp.f32 %v1773_v39 }
 0x697   : > { %v1413_v19 = vpop.permute.xlu0 %1412 }
 0x698   : > { %v1415_v15 = vpop.permute.xlu1 %1414 }
 0x699   : > { %v1422_v16 = vcombine.low %v1411_v37, %v1415_v15  ;;  %v1423_v17 = vcombine.high %v1411_v37, %v1415_v15 }
 0x69b   : > { %v1430_v26 = vrot.slane %v1422_v16, %v5620_v48  ;;  %v1437_v27 = vrot.slane %v1423_v17, %v5620_v48 }
 0x69c   : > { %v1417_v20 = vpop.permute.xlu1 %1416 }
 0x69d   : > { %v1438_v23 = vcombine.low %v1413_v19, %v1417_v20  ;;  %v1439_v25 = vcombine.high %v1413_v19, %v1417_v20 }
 0x69e   : > { %v4511_v55 = vpop.eup %4510 }
 0x69f   : > { %v1446_v28 = vrot.slane %v1438_v23, %v5620_v48  ;;  %v1453_v29 = vrot.slane %v1439_v25, %v5620_v48  ;;  %v4513_v61 = vpop.eup %4512  ;;  %v1788_v33 = vmul.f32 %v4511_v55, %v5689_v0 }
 0x6a0   : > { %v1787_v5 = vmul.f32 %v4513_v61, %v5691_v2 }
 0x6a1   : > { %v1454_v30 = vcombine.low %v1430_v26, %v1446_v28  ;;  %v1455_v31 = vcombine.high %v1430_v26, %v1446_v28  ;;  %v1470_v32 = vcombine.low %v1437_v27, %v1453_v29  ;;  %v1471_v34 = vcombine.high %v1437_v27, %v1453_v29 }
 0x6a2   : > { %v1791_v37 = vpack.c.bf16 %v1787_v5, %v1787_v5  ;;  %v1792_v39 = vpack.c.bf16 %v1788_v33, %v1788_v33 }
 0x6a3   : > { %v1462_v35 = vrot.slane %v1454_v30, %v5631_v58  ;;  %v1469_v36 = vrot.slane %v1455_v31, %v5631_v58  ;;  %v1478_v40 = vrot.slane %v1470_v32, %v5631_v58  ;;  %v1485_v41 = vrot.slane %v1471_v34, %v5631_v58 }
 0x6a5   : > { %v1490_v42 = vcombine.low %v1462_v35, %v1469_v36  ;;  %v4049_v43 = vcombine.high %v1462_v35, %v1469_v36  ;;  %v1506_v44 = vcombine.low %v1478_v40, %v1485_v41  ;;  %v4050_v45 = vcombine.high %v1478_v40, %v1485_v41 }
 0x6a7   : > { %v1497_v46 = vrot.slane %v1490_v42, %v5620_v48  ;;  %v1505_v47 = vrot.slane %v4049_v43, %v5620_v48  ;;  %v1513_v49 = vrot.slane %v1506_v44, %v5620_v48  ;;  %v1521_v50 = vrot.slane %v4050_v45, %v5620_v48 }
 0x6a9   : > { %v1522_v51 = vcombine.low %v1497_v46, %v1505_v47  ;;  %v1538_v52 = vcombine.low %v1513_v49, %v1521_v50  ;;  %v1523_v53 = vcombine.high %v1497_v46, %v1505_v47  ;;  %v1539_v54 = vcombine.high %v1513_v49, %v1521_v50 }
 0x6ab   : > { %v1530_v56 = vrot.slane %v1522_v51, %v5631_v58  ;;  %v1546_v57 = vrot.slane %v1538_v52, %v5631_v58  ;;  %v1537_v59 = vrot.slane %v1523_v53, %v5631_v58  ;;  %v1553_v60 = vrot.slane %v1539_v54, %v5631_v58  ;;  %v4484_v53 = vld [vmem:[%s5521_s20] sm:$0xff]  }
 0x6ad   : > { %v1554_v62 = vcombine.low %v1530_v56, %v1546_v57  ;;  %v1555_v63 = vcombine.high %v1530_v56, %v1546_v57  ;;  %v1556_v3 = vcombine.low %v1537_v59, %v1553_v60  ;;  %v1557_v4 = vcombine.high %v1537_v59, %v1553_v60 }
 0x6af   : > { %v1558_v6 = vpack.c.bf16 %v1554_v62, %v1554_v62  ;;  %v1559_v7 = vpack.c.bf16 %v1555_v63, %v1555_v63  ;;  %v1560_v12 = vpack.c.bf16 %v1556_v3, %v1556_v3  ;;  %v1561_v38 = vpack.c.bf16 %v1557_v4, %v1557_v4  ;;  %v4485_v63 = vld [vmem:[%s5521_s20 + $0x8] sm:$0xff]  }
 0x6b1   : > { %v1800_v8 = vsel %vm1798_vm7, %v1558_v6, 0  ;;  %v1846_v10 = vsel %vm1798_vm7, %v1559_v7, 0  ;;  %v1892_v0 = vsel %vm1798_vm7, %v1560_v12, 0  ;;  %v1938_v2 = vsel %vm1798_vm7, %v1561_v38, 0 }
 0x6b2   : > { %4207 = vmatpush3.bf16.msra.mxu1 %v1800_v8  ;;  %4213 = vmatpush3.bf16.msra.mxu0 %v1846_v10 }
 0x6b3   : > { %4218 = vmatprep.subr.bf16.mxu1 %v4942_v9  ;;  %4224 = vmatprep.subr.bf16.mxu0 %v4942_v9 }
 0x6b5   : > { %4209 = vmatmul.mubr.msk.bf16.vlgmr.msra.gmra.mrb[12].mxu1 %vm1562_vm5, %v1791_v37  ;;  %4215 = vmatmul.mubr.msk.bf16.vlgmr.msra.gmra.mrb[8].mxu0 %vm1562_vm5, %v1792_v39 }
 0x6b6   : > { %4219 = vmatpush3.bf16.msra.mxu1 %v1892_v0  ;;  %4225 = vmatpush3.bf16.msra.mxu0 %v1938_v2 }
 0x6b7   : > { %4220 = vmatprep.mubr.msk.bf16.mxu1 %vm4943_vm2, %v4942_v9  ;;  %4226 = vmatprep.mubr.msk.bf16.mxu0 %vm4943_vm2, %v4942_v9 }
 0x6b8   : > { %4230 = vmatprep.subr.bf16.mxu1 %v4942_v9  ;;  %4238 = vmatprep.subr.bf16.mxu0 %v4942_v9 }
 0x6c8   : > { %v1779_v14 = vpop.xlane.xlu0 %1778 }
 0x6c9   : > { %4514 = vrcp.f32 %v1779_v14 }
 0x6cd   : > { %v1782_v15 = vpop.xlane.xlu1 %1781 }
 0x6ce   : > { %4516 = vrcp.f32 %v1782_v15 }
 0x6d3   : > { %v4515_v16 = vpop.eup %4514 }
 0x6d4   : > { %v1789_v17 = vmul.f32 %v4515_v16, %v5700_v11 }
 0x6d6   : > { %v1793_v19 = vpack.c.bf16 %v1789_v17, %v1789_v17 }
 0x6d8   : > { %v4517_v20 = vpop.eup %4516  ;;  %4221 = vmatmul.mubr.msk.bf16.vlgmr.msra.gmra.mrb[16].mxu1 %vm1562_vm5, %v1793_v19 }
 0x6d9   : > { %v1790_v23 = vmul.f32 %v4517_v20, %v5704_v13  ;;  %4234 = vmatprep.mubr.msk.bf16.mxu1 %vm4943_vm2, %v4942_v9  ;;  %4231 = vmatpush3.bf16.msra.mxu1 %v4484_v53 }
 0x6da   : > { %4232 = vmatprep.subr.bf16.mxu1 %v4942_v9 }
 0x6db   : > { %v1794_v25 = vpack.c.bf16 %v1790_v23, %v1790_v23 }
 0x6dd   : > { %4227 = vmatmul.mubr.msk.bf16.vlgmr.msra.gmra.mrb[12].mxu0 %vm1562_vm5, %v1794_v25  ;;  %4233 = vmatpush3.bf16.msra.mxu1 %v4485_v63 }
 0x6de   : > { %4242 = vmatprep.mubr.msk.bf16.mxu0 %vm4943_vm2, %v4942_v9  ;;  %4246 = vmatprep.subr.bf16.mxu1 %v4942_v9 }
 0x788   : > { %v1836_v26 = vpop.f32.mrb[12].mxu1  ;;  %v1882_v27 = vpop.f32.mrb[8].mxu0 }
 0x789   : > { %v4210_v28 = vpop.f32.mrb[13].mxu1  ;;  %v4216_v29 = vpop.f32.mrb[9].mxu0 }
 0x78a   : > { %v1839_v11 = vpop.f32.mrb[14].mxu1  ;;  %v1885_v30 = vpop.f32.mrb[10].mxu0 }
 0x78b   : > { %v4211_v31 = vpop.f32.mrb[15].mxu1  ;;  %v4217_v32 = vpop.f32.mrb[11].mxu0  ;;  %v5782_v30 = vld [vmem:[%s969_s24] sm:$0x7]  ;;  %s6258_s24 = scalar_lea.vmem [#allocation6], %s5461_s19 }
 0x78c   : > { %v2197_v31 = vrot.slane %v5782_v30, %v5576_v21 }
 0x7ab   : > { %v1928_v34 = vpop.f32.mrb[16].mxu1 }
 0x7ac   : > { %v1980_v13 = vcombine.low %v1836_v26, %v1928_v34  ;;  %v1981_v35 = vcombine.high %v1836_v26, %v1928_v34  ;;  %v4222_v36 = vpop.f32.mrb[17].mxu1 }
 0x7ad   : > { %v1931_v40 = vpop.f32.mrb[18].mxu1 }
 0x7ae   : > { %v4223_v41 = vpop.f32.mrb[19].mxu1  ;;  %v1988_v47 = vrot.slane %v1980_v13, %v5620_v48  ;;  %v1995_v49 = vrot.slane %v1981_v35, %v5620_v48 }
 0x7b0   : > { %v1974_v42 = vpop.f32.mrb[12].mxu0 }
 0x7b1   : > { %v1996_v43 = vcombine.low %v1882_v27, %v1974_v42  ;;  %v1997_v44 = vcombine.high %v1882_v27, %v1974_v42  ;;  %v4228_v45 = vpop.f32.mrb[13].mxu0  ;;  %v4486_v42 = vld [vmem:[%s5490_s14] sm:$0xff]  }
 0x7b2   : > { %v1977_v46 = vpop.f32.mrb[14].mxu0 }
 0x7b3   : > { %v2004_v50 = vrot.slane %v1996_v43, %v5620_v48  ;;  %v2011_v51 = vrot.slane %v1997_v44, %v5620_v48  ;;  %v4229_v52 = vpop.f32.mrb[15].mxu0  ;;  %v4487_v43 = vld [vmem:[%s5490_s14 + $0x8] sm:$0xff]   ;;  %v998_v44 = vld [vmem:[%s6258_s24] sm:$0xff]  ;;  %s6259_s14 = scalar_lea.vmem [#allocation14], %s5482_s17  ;;  %s6260_s17 = scalar_lea.vmem [#allocation8], %s5458_s3 }
 0x7b4   : > { %v999_v45 = vpack.c.bf16 %v998_v44, %v998_v44  ;;  %v4489_v52 = vld [vmem:[%s5521_s20 + $0x18] sm:$0xff]   ;;  %v4071_v53 = vld [vmem:[%s6259_s14] ss:$0 sm:$0xff] }
 0x7b5   : > { %v2012_v54 = vcombine.low %v1988_v47, %v2004_v50  ;;  %v2013_v55 = vcombine.high %v1988_v47, %v2004_v50  ;;  %v2028_v56 = vcombine.low %v1995_v49, %v2011_v51  ;;  %v2029_v57 = vcombine.high %v1995_v49, %v2011_v51  ;;  %v4488_v51 = vld [vmem:[%s5521_s20 + $0x10] sm:$0xff]  }
 0x7b6   : > { %4239 = vmatpush3.bf16.msra.mxu0 %v4488_v51 }
 0x7b7   : > { %v2020_v59 = vrot.slane %v2012_v54, %v5631_v58  ;;  %v2027_v60 = vrot.slane %v2013_v55, %v5631_v58  ;;  %v2036_v61 = vrot.slane %v2028_v56, %v5631_v58  ;;  %v2043_v62 = vrot.slane %v2029_v57, %v5631_v58  ;;  %4240 = vmatprep.subr.bf16.mxu0 %v4942_v9 }
 0x7b9   : > { %v2048_v3 = vcombine.low %v2020_v59, %v2027_v60  ;;  %v4059_v4 = vcombine.high %v2020_v59, %v2027_v60  ;;  %v2064_v33 = vcombine.low %v2036_v61, %v2043_v62  ;;  %v4060_v5 = vcombine.high %v2036_v61, %v2043_v62 }
 0x7ba   : > { %4241 = vmatpush3.bf16.msra.mxu0 %v4489_v52 }
 0x7bb   : > { %v2055_v6 = vrot.slane %v2048_v3, %v5620_v48  ;;  %v2063_v7 = vrot.slane %v4059_v4, %v5620_v48  ;;  %v2071_v8 = vrot.slane %v2064_v33, %v5620_v48  ;;  %v2079_v10 = vrot.slane %v4060_v5, %v5620_v48  ;;  %4254 = vmatprep.subr.bf16.mxu0 %v4942_v9 }
 0x7bd   : > { %v2081_v12 = vcombine.high %v2055_v6, %v2063_v7  ;;  %v2097_v38 = vcombine.high %v2071_v8, %v2079_v10  ;;  %v2080_v37 = vcombine.low %v2055_v6, %v2063_v7  ;;  %v2096_v39 = vcombine.low %v2071_v8, %v2079_v10 }
 0x7be   : > { %v2211_v6 = vsub.s32 1, %v5573_v18 }
 0x7bf   : > { %v2095_v0 = vrot.slane %v2081_v12, %v5631_v58  ;;  %v2111_v2 = vrot.slane %v2097_v38, %v5631_v58  ;;  %v2088_v14 = vrot.slane %v2080_v37, %v5631_v58  ;;  %v2104_v15 = vrot.slane %v2096_v39, %v5631_v58 }
 0x7c0   : > { %v2212_v7 = vrot.slane %v5579_v22, %v2211_v6  ;;  %v2227_v10 = vrot.slane %v5584_v24, %v2211_v6 }
 0x7c1   : > { %v2114_v16 = vcombine.low %v2095_v0, %v2111_v2  ;;  %v2113_v17 = vcombine.high %v2088_v14, %v2104_v15  ;;  %v2115_v19 = vcombine.high %v2095_v0, %v2111_v2  ;;  %v2112_v20 = vcombine.low %v2088_v14, %v2104_v15 }
 0x7c3   : > { %2121 = vrot.lane.b32.xlu1 %v2114_v16, %s4951_s28  ;;  %2117 = vrot.lane.b32.xlu0 %v2113_v17, %s4952_s27 }
 0x7c7   : > { %2125 = vrot.lane.b32.xlu0 %v2115_v19, %s4953_s18 }
 0x835   : > { %v2118_v23 = vpop.permute.xlu0 %2117  ;;  %v2122_v25 = vpop.permute.xlu1 %2121 }
 0x836   : > { %v2128_v26 = vsel %vm1562_vm5, %v2112_v20, %v2118_v23 }
 0x837   : > { %v2130_v28 = vsel %vm2129_vm8, %v2128_v26, %v2122_v25 }
 0x839   : > { %v2126_v27 = vpop.permute.xlu0 %2125 }
 0x83a   : > { %v2132_v29 = vsel %vm2131_vm9, %v2130_v28, %v2126_v27 }
 0x83b   : > { %v2133_v11 = vpack.c.bf16 %v2132_v29, %v2132_v29 }
 0x83d   : > { %4235 = vmatmul.mubr.msk.bf16.vlgmr.msra.gmra.mrb[20].mxu1 %vm1009_vm1, %v2133_v11 }
 0x83e   : > { %4250 = vmatprep.mubr.msk.bf16.mxu1 %vm4943_vm2, %v4942_v9  ;;  %4247 = vmatpush3.bf16.msra.mxu1 %v4486_v42 }
 0x83f   : > { %4248 = vmatprep.subr.bf16.mxu1 %v4942_v9 }
 0x842   : > { %4249 = vmatpush3.bf16.msra.mxu1 %v4487_v43 }
 0x843   : > { %4260 = vmatprep.subr.bf16.mxu1 %v4942_v9 }
 0x845   : > { %4251 = vmatmul.mubr.msk.bf16.vlgmr.msra.gmra.mrb[24].mxu1 %vm1009_vm1, %v999_v45 }
 0x846   : > { %4262 = vmatprep.mubr.msk.bf16.mxu1 %vm4943_vm2, %v4942_v9 }
 0x910   : > { %v2187_v32 = vpop.f32.mrb[20].mxu1 }
 0x911   : > { %v2193_v34 = vadd.f32 %v2187_v32, %v5557_v1  ;;  %v4236_v13 = vpop.f32.mrb[21].mxu1 }
 0x912   : > { %v2190_v35 = vpop.f32.mrb[22].mxu1 }
 0x913   : > { %v5787_v36 = vadd.f32 %v2197_v31, %v2193_v34  ;;  %v4237_v40 = vpop.f32.mrb[23].mxu1 }
 0x915   : > { %v2199_v41 = vsel %vm1009_vm1, %v5787_v36, 0.0 }
 0x916   : > { %2200 = vadd.xlane.f32.xlu1 %v2199_v41 }
 0x918   : > { %v2354_v54 = vpop.f32.mrb[24].mxu1 }
 0x919   : > { %v5808_v55 = vadd.f32 %v4071_v53, %v2354_v54  ;;  %v4252_v56 = vpop.f32.mrb[25].mxu1 }
 0x91a   : > { %v2357_v57 = vpop.f32.mrb[26].mxu1 }
 0x91b   : > { %v4253_v59 = vpop.f32.mrb[27].mxu1 }
 0x927   : > { %2514 = vrot.lane.b32.xlu1 %v5808_v55, %s4946_s1 }
 0x92b   : > { %2517 = vrot.lane.b32.xlu1 %v5808_v55, %s4944_s23 }
 0x9a3   : > { %v2201_v1 = vpop.xlane.xlu1 %2200 }
 0x9a4   : > { %v2202_v46 = vmul.f32 0.03125, %v2201_v1 }
 0x9a6   : > { %v2203_v47 = vsub.f32 %v5787_v36, %v2202_v46 }
 0x9a7   : > { %v5822_v0 = vpop.permute.xlu1 %2514 }
 0x9a8   : > { %v2204_v49 = vmul.f32 %v2203_v47, %v2203_v47  ;;  %v2213_v8 = vmul.f32 %v2212_v7, %v2203_v47  ;;  %v2520_v22 = vcombine.low %v5808_v55, %v5822_v0  ;;  %v2521_v24 = vcombine.high %v5808_v55, %v5822_v0 }
 0x9aa   : > { %v2205_v50 = vsel %vm1009_vm1, %v2204_v49, 0.0  ;;  %v2528_v17 = vrot.slane %v2520_v22, %v5620_v48  ;;  %v2535_v19 = vrot.slane %v2521_v24, %v5620_v48 }
 0x9ab   : > { %2206 = vadd.xlane.f32.xlu0 %v2205_v50  ;;  %v5824_v2 = vpop.permute.xlu1 %2517 }
 0x9c1   : > { %2511 = vrot.lane.b32.xlu0 %v5808_v55, %s4945_s13 }
 0xa38   : > { %v2207_v60 = vpop.xlane.xlu0 %2206 }
 0xa39   : > { %v2208_v61 = vmul.f32 0.032258064, %v2207_v60 }
 0xa3b   : > { %4518 = vrsqrt.f32 %v2208_v61  ;;  %vm2216_vm10 = vcmp.eq.f32.partialorder %v2208_v61, inf  ;;  %v2219_v3 = vand.u32 2147483648, %v2208_v61  ;;  %vm2218_vm11 = vcmp.eq.f32.partialorder %v2208_v61, 0.0 }
 0xa3c   : > { %v5826_v14 = vpop.permute.xlu0 %2511 }
 0xa3d   : > { %v2536_v15 = vcombine.low %v5826_v14, %v5824_v2  ;;  %v2537_v16 = vcombine.high %v5826_v14, %v5824_v2 }
 0xa3f   : > { %v2544_v20 = vrot.slane %v2536_v15, %v5620_v48  ;;  %v2551_v23 = vrot.slane %v2537_v16, %v5620_v48 }
 0xa41   : > { %v2552_v25 = vcombine.low %v2528_v17, %v2544_v20  ;;  %v2553_v26 = vcombine.high %v2528_v17, %v2544_v20  ;;  %v2568_v27 = vcombine.low %v2535_v19, %v2551_v23  ;;  %v2569_v28 = vcombine.high %v2535_v19, %v2551_v23 }
 0xa43   : > { %v2560_v29 = vrot.slane %v2552_v25, %v5631_v58  ;;  %v2567_v11 = vrot.slane %v2553_v26, %v5631_v58  ;;  %v2576_v31 = vrot.slane %v2568_v27, %v5631_v58  ;;  %v2583_v32 = vrot.slane %v2569_v28, %v5631_v58 }
 0xa45   : > { %v4519_v62 = vpop.eup %4518  ;;  %v2588_v34 = vcombine.low %v2560_v29, %v2567_v11  ;;  %v4077_v13 = vcombine.high %v2560_v29, %v2567_v11  ;;  %v2604_v35 = vcombine.low %v2576_v31, %v2583_v32  ;;  %v4078_v40 = vcombine.high %v2576_v31, %v2583_v32 }
 0xa46   : > { %v2215_v63 = vmul.f32 %v4519_v62, %v2208_v61 }
 0xa47   : > { %v2595_v41 = vrot.slane %v2588_v34, %v5620_v48  ;;  %v2603_v42 = vrot.slane %v4077_v13, %v5620_v48  ;;  %v2611_v43 = vrot.slane %v2604_v35, %v5620_v48  ;;  %v2619_v44 = vrot.slane %v4078_v40, %v5620_v48 }
 0xa48   : > { %v2217_v4 = vsel %vm2216_vm10, %v2208_v61, %v2215_v63  ;;  %v2238_v63 = vrot.slane %v5782_v30, %v2211_v6 }
 0xa49   : > { %v2220_v33 = vsel %vm2218_vm11, %v2219_v3, %v2217_v4  ;;  %v2620_v45 = vcombine.low %v2595_v41, %v2603_v42  ;;  %v2636_v1 = vcombine.low %v2611_v43, %v2619_v44  ;;  %v2621_v46 = vcombine.high %v2595_v41, %v2603_v42 }
 0xa4a   : > { %v2221_v5 = vadd.f32 1e-06, %v2220_v33  ;;  %v2637_v47 = vcombine.high %v2611_v43, %v2619_v44 }
 0xa4b   : > { %v2628_v49 = vrot.slane %v2620_v45, %v5631_v58  ;;  %v2644_v50 = vrot.slane %v2636_v1, %v5631_v58  ;;  %v2635_v51 = vrot.slane %v2621_v46, %v5631_v58 }
 0xa4c   : > { %4520 = vrcp.f32 %v2221_v5  ;;  %v2651_v52 = vrot.slane %v2637_v47, %v5631_v58 }
 0xa4d   : > { %v2652_v53 = vcombine.low %v2628_v49, %v2644_v50  ;;  %v2653_v54 = vcombine.high %v2628_v49, %v2644_v50 }
 0xa4e   : > { %v5852_v56 = vcombine.low %v2635_v51, %v2651_v52  ;;  %v5854_v57 = vcombine.high %v2635_v51, %v2651_v52 }
 0xa4f   : > { %v2656_v59 = vpack.c.bf16 %v2652_v53, %v2652_v53  ;;  %v2657_v60 = vpack.c.bf16 %v2653_v54, %v2653_v54 }
 0xa50   : > { %v2658_v49 = vpack.c.bf16 %v5852_v56, %v5852_v56  ;;  %v2659_v50 = vpack.c.bf16 %v5854_v57, %v5854_v57 }
 0xa51   : > { %v2822_v61 = vsel %vm1562_vm5, %v2656_v59, 0  ;;  %v2868_v62 = vsel %vm1562_vm5, %v2657_v60, 0 }
 0xa52   : > { %4261 = vmatpush3.bf16.xpose.msra.mxu1 %v2868_v62  ;;  %v2914_v59 = vsel %vm1562_vm5, %v2658_v49, 0  ;;  %v2960_v60 = vsel %vm1562_vm5, %v2659_v50, 0 }
 0xa53   : > { %4272 = vmatprep.subr.bf16.mxu1 %v4942_v9 }
 0xa56   : > { %v4521_v12 = vpop.eup %4520 }
 0xa57   : > { %v2223_v38 = vmul.f32 %v4521_v12, %v2213_v8 }
 0xa59   : > { %v2228_v37 = vadd.f32 %v2227_v10, %v2223_v38 }
 0xa5b   : > { %v2229_v39 = vpack.c.bf16 %v2228_v37, %v2228_v37 }
 0xa5d   : > { %4243 = vmatmul.mubr.msk.bf16.vlgmr.msra.gmra.mrb[16].mxu0 %vm1009_vm1, %v2229_v39 }
 0xa5e   : > { %4256 = vmatprep.mubr.msk.bf16.mxu0 %vm4943_vm2, %v4942_v9  ;;  %4255 = vmatpush3.bf16.xpose.msra.mxu0 %v2822_v61 }
 0xa5f   : > { %4266 = vmatprep.subr.bf16.mxu0 %v4942_v9 }
 0xb30   : > { %v2288_v3 = vpop.f32.mrb[16].mxu0 }
 0xb31   : > { %v2289_v4 = vadd.f32 %v2288_v3, %v2238_v63  ;;  %v4244_v33 = vpop.f32.mrb[17].mxu0  ;;  %v1003_v63 = vld [vmem:[%s6260_s17] sm:$0x1] }
 0xb32   : > { %v2291_v5 = vpop.f32.mrb[18].mxu0  ;;  %vm1004_vm12 = vcmp.eq.f32.partialorder %v1003_v63, 0.0 }
 0xb33   : > { %v4245_v7 = vpop.f32.mrb[19].mxu0  ;;  %2364 = vrot.lane.b32.xlu1 %v2289_v4, %s4946_s1  ;;  %2361 = vrot.lane.b32.xlu0 %v2289_v4, %s4945_s13  ;;  %v1005_v3 = vsel %vm1004_vm12, -1e+09, %v4942_v9 }
 0xb37   : > { %2367 = vrot.lane.b32.xlu0 %v2289_v4, %s4944_s23 }
 0xba5   : > { %v2365_v8 = vpop.permute.xlu1 %2364  ;;  %v2362_v10 = vpop.permute.xlu0 %2361 }
 0xba6   : > { %v2370_v12 = vcombine.low %v2289_v4, %v2365_v8  ;;  %v2371_v38 = vcombine.high %v2289_v4, %v2365_v8  ;;  %v2816_v4 = vrot.slane %v1005_v3, %v5576_v21 }
 0xba8   : > { %v2378_v6 = vrot.slane %v2370_v12, %v5620_v48  ;;  %v2385_v24 = vrot.slane %v2371_v38, %v5620_v48 }
 0xba9   : > { %v2368_v37 = vpop.permute.xlu0 %2367 }
 0xbaa   : > { %v2386_v39 = vcombine.low %v2362_v10, %v2368_v37  ;;  %v2387_v22 = vcombine.high %v2362_v10, %v2368_v37 }
 0xbac   : > { %v2394_v15 = vrot.slane %v2386_v39, %v5620_v48  ;;  %v2401_v16 = vrot.slane %v2387_v22, %v5620_v48 }
 0xbae   : > { %v2402_v17 = vcombine.low %v2378_v6, %v2394_v15  ;;  %v2403_v19 = vcombine.high %v2378_v6, %v2394_v15  ;;  %v2418_v20 = vcombine.low %v2385_v24, %v2401_v16  ;;  %v2419_v23 = vcombine.high %v2385_v24, %v2401_v16 }
 0xbb0   : > { %v2410_v25 = vrot.slane %v2402_v17, %v5631_v58  ;;  %v2417_v26 = vrot.slane %v2403_v19, %v5631_v58  ;;  %v2426_v27 = vrot.slane %v2418_v20, %v5631_v58  ;;  %v2433_v28 = vrot.slane %v2419_v23, %v5631_v58 }
 0xbb2   : > { %v2438_v29 = vcombine.low %v2410_v25, %v2417_v26  ;;  %v4075_v11 = vcombine.high %v2410_v25, %v2417_v26  ;;  %v2454_v31 = vcombine.low %v2426_v27, %v2433_v28  ;;  %v4076_v32 = vcombine.high %v2426_v27, %v2433_v28 }
 0xbb4   : > { %v2445_v34 = vrot.slane %v2438_v29, %v5620_v48  ;;  %v2453_v13 = vrot.slane %v4075_v11, %v5620_v48  ;;  %v2461_v35 = vrot.slane %v2454_v31, %v5620_v48  ;;  %v2469_v40 = vrot.slane %v4076_v32, %v5620_v48 }
 0xbb6   : > { %v2470_v41 = vcombine.low %v2445_v34, %v2453_v13  ;;  %v2486_v42 = vcombine.low %v2461_v35, %v2469_v40  ;;  %v2471_v43 = vcombine.high %v2445_v34, %v2453_v13  ;;  %v2487_v44 = vcombine.high %v2461_v35, %v2469_v40 }
 0xbb8   : > { %v2478_v45 = vrot.slane %v2470_v41, %v5631_v58  ;;  %v2494_v1 = vrot.slane %v2486_v42, %v5631_v58  ;;  %v2485_v53 = vrot.slane %v2471_v43, %v5631_v58  ;;  %v2501_v54 = vrot.slane %v2487_v44, %v5631_v58 }
 0xbba   : > { %v2502_v46 = vcombine.low %v2478_v45, %v2494_v1  ;;  %v2503_v47 = vcombine.high %v2478_v45, %v2494_v1  ;;  %v2504_v56 = vcombine.low %v2485_v53, %v2501_v54  ;;  %v2505_v57 = vcombine.high %v2485_v53, %v2501_v54 }
 0xbbc   : > { %v2506_v51 = vpack.c.bf16 %v2502_v46, %v2502_v46  ;;  %v2507_v52 = vpack.c.bf16 %v2503_v47, %v2503_v47  ;;  %v2508_v61 = vpack.c.bf16 %v2504_v56, %v2504_v56  ;;  %v2509_v62 = vpack.c.bf16 %v2505_v57, %v2505_v57 }
 0xbbe   : > { %4257 = vmatmul.mubr.msk.bf16.vlgmr.msra.gmra.mrb[20].mxu0 %vm1562_vm5, %v2506_v51  ;;  %4263 = vmatmul.mubr.msk.bf16.vlgmr.msra.gmra.mrb[28].mxu1 %vm1562_vm5, %v2507_v52 }
 0xbbf   : > { %4267 = vmatpush3.bf16.xpose.msra.mxu0 %v2914_v59  ;;  %4273 = vmatpush3.bf16.xpose.msra.mxu1 %v2960_v60 }
 0xbc0   : > { %4268 = vmatprep.mubr.msk.bf16.mxu0 %vm4943_vm2, %v4942_v9  ;;  %4274 = vmatprep.mubr.msk.bf16.mxu1 %vm4943_vm2, %v4942_v9 }
 0xbc1   : > { %4278 = vmatprep.subr.bf16.mxu0 %v4942_v9  ;;  %4284 = vmatprep.subr.bf16.mxu1 %v4942_v9 }
 0xbc6   : > { %4269 = vmatmul.mubr.msk.bf16.vlgmr.msra.gmra.mrb[24].mxu0 %vm1562_vm5, %v2508_v61  ;;  %4275 = vmatmul.mubr.msk.bf16.vlgmr.msra.gmra.mrb[32].mxu1 %vm1562_vm5, %v2509_v62 }
 0xbc7   : > { %4280 = vmatprep.mubr.msk.bf16.mxu0 %vm4943_vm2, %v4942_v9  ;;  %4286 = vmatprep.mubr.msk.bf16.mxu1 %vm4943_vm2, %v4942_v9 }
 0xc91   : > { %v2858_v33 = vpop.f32.mrb[20].mxu0  ;;  %v2904_v5 = vpop.f32.mrb[28].mxu1 }
 0xc92   : > { %v2859_v7 = vadd.f32 %v2858_v33, %v2816_v4  ;;  %v2905_v8 = vadd.f32 %v2904_v5, %v2816_v4  ;;  %v4258_v10 = vpop.f32.mrb[21].mxu0  ;;  %v4264_v12 = vpop.f32.mrb[29].mxu1 }
 0xc93   : > { %v2861_v38 = vpop.f32.mrb[22].mxu0  ;;  %v2907_v37 = vpop.f32.mrb[30].mxu1 }
 0xc94   : > { %v4259_v39 = vpop.f32.mrb[23].mxu0  ;;  %v4265_v22 = vpop.f32.mrb[31].mxu1  ;;  %v3002_v6 = vsel %vm1562_vm5, %v2859_v7, -inf  ;;  %v3005_v24 = vsel %vm1562_vm5, %v2905_v8, -inf }
 0xc95   : > { %3003 = vmax.xlane.f32.xlu1 %v3002_v6  ;;  %3006 = vmax.xlane.f32.xlu0 %v3005_v24 }
 0xc99   : > { %v2950_v15 = vpop.f32.mrb[24].mxu0  ;;  %v2996_v16 = vpop.f32.mrb[32].mxu1 }
 0xc9a   : > { %v2951_v17 = vadd.f32 %v2950_v15, %v2816_v4  ;;  %v2997_v21 = vadd.f32 %v2996_v16, %v2816_v4  ;;  %v4270_v19 = vpop.f32.mrb[25].mxu0  ;;  %v4276_v20 = vpop.f32.mrb[33].mxu1 }
 0xc9b   : > { %v2953_v23 = vpop.f32.mrb[26].mxu0  ;;  %v2999_v25 = vpop.f32.mrb[34].mxu1 }
 0xc9c   : > { %v4271_v26 = vpop.f32.mrb[27].mxu0  ;;  %v4277_v27 = vpop.f32.mrb[35].mxu1  ;;  %v3008_v28 = vsel %vm1562_vm5, %v2951_v17, -inf  ;;  %v3011_v29 = vsel %vm1562_vm5, %v2997_v21, -inf }
 0xc9d   : > { %3009 = vmax.xlane.f32.xlu0 %v3008_v28  ;;  %3012 = vmax.xlane.f32.xlu1 %v3011_v29 }
 0xcae   : > { %2662 = vrot.lane.b32.xlu1 %v5826_v14, %s4947_s30 }
 0xcb3   : > { %2660 = vrot.lane.b32.xlu0 %v5808_v55, %s4947_s30 }
 0xd22   : > { %v3004_v11 = vpop.xlane.xlu1 %3003  ;;  %v3007_v31 = vpop.xlane.xlu0 %3006 }
 0xd23   : > { %v3014_v32 = vsub.f32 %v2859_v7, %v3004_v11  ;;  %v3015_v34 = vsub.f32 %v2905_v8, %v3007_v31 }
 0xd25   : > { %v3018_v13 = vmul.f32 1.442695, %v3014_v32  ;;  %v3020_v35 = vmul.f32 1.442695, %v3015_v34 }
 0xd27   : > { %4522 = vpow2.f32 %v3018_v13 }
 0xd28   : > { %4524 = vpow2.f32 %v3020_v35 }
 0xd2a   : > { %v3013_v55 = vpop.xlane.xlu1 %3012  ;;  %v3010_v43 = vpop.xlane.xlu0 %3009 }
 0xd2b   : > { %v3017_v44 = vsub.f32 %v2997_v21, %v3013_v55  ;;  %v3016_v45 = vsub.f32 %v2951_v17, %v3010_v43 }
 0xd2d   : > { %v3024_v1 = vmul.f32 1.442695, %v3017_v44  ;;  %v3022_v46 = vmul.f32 1.442695, %v3016_v45 }
 0xd2e   : > { %v2663_v51 = vpop.permute.xlu1 %2662 }
 0xd2f   : > { %4526 = vpow2.f32 %v3024_v1 }
 0xd30   : > { %4528 = vpow2.f32 %v3022_v46 }
 0xd31   : > { %v5912_v40 = vpop.eup %4522 }
 0xd32   : > { %v5914_v41 = vpop.eup %4524  ;;  %v3026_v42 = vsel %vm1562_vm5, %v5912_v40, 0.0 }
 0xd33   : > { %3027 = vadd.xlane.f32.xlu0 %v3026_v42  ;;  %v3029_v14 = vsel %vm1562_vm5, %v5914_v41, 0.0 }
 0xd34   : > { %3030 = vadd.xlane.f32.xlu1 %v3029_v14 }
 0xd39   : > { %v5924_v47 = vpop.eup %4526 }
 0xd3a   : > { %v5926_v49 = vpop.eup %4528  ;;  %v3035_v50 = vsel %vm1562_vm5, %v5924_v47, 0.0 }
 0xd45   : > { %2664 = vrot.lane.b32.xlu1 %v5822_v0, %s4947_s30  ;;  %v3032_v0 = vsel %vm1562_vm5, %v5926_v49, 0.0 }
 0xd49   : > { %2666 = vrot.lane.b32.xlu0 %v5824_v2, %s4947_s30  ;;  %v2661_v2 = vpop.permute.xlu0 %2660 }
 0xd68   : > { %3036 = vadd.xlane.f32.xlu0 %v3035_v50 }
 0xd69   : > { %3033 = vadd.xlane.f32.xlu1 %v3032_v0 }
 0xdc0   : > { %v3028_v52 = vpop.xlane.xlu0 %3027 }
 0xdc1   : > { %v3031_v53 = vpop.xlane.xlu1 %3030  ;;  %4530 = vrcp.f32 %v3028_v52 }
 0xdc2   : > { %4532 = vrcp.f32 %v3031_v53 }
 0xdc4   : > { %v2667_v54 = vpop.permute.xlu0 %2666 }
 0xdc5   : > { %v2688_v59 = vcombine.low %v2663_v51, %v2667_v54  ;;  %v2689_v60 = vcombine.high %v2663_v51, %v2667_v54  ;;  %v2665_v56 = vpop.permute.xlu1 %2664 }
 0xdc6   : > { %v2672_v57 = vcombine.low %v2661_v2, %v2665_v56  ;;  %v2673_v61 = vcombine.high %v2661_v2, %v2665_v56 }
 0xdc7   : > { %v2696_v62 = vrot.slane %v2688_v59, %v5620_v48  ;;  %v2703_v63 = vrot.slane %v2689_v60, %v5620_v48 }
 0xdc8   : > { %v2680_v3 = vrot.slane %v2672_v57, %v5620_v48  ;;  %v2687_v4 = vrot.slane %v2673_v61, %v5620_v48 }
 0xdca   : > { %v2704_v33 = vcombine.low %v2680_v3, %v2696_v62  ;;  %v2705_v5 = vcombine.high %v2680_v3, %v2696_v62  ;;  %v2720_v7 = vcombine.low %v2687_v4, %v2703_v63  ;;  %v2721_v8 = vcombine.high %v2687_v4, %v2703_v63 }
 0xdcb   : > { %v4531_v28 = vpop.eup %4530 }
 0xdcc   : > { %v2712_v10 = vrot.slane %v2704_v33, %v5631_v58  ;;  %v2719_v12 = vrot.slane %v2705_v5, %v5631_v58  ;;  %v2728_v38 = vrot.slane %v2720_v7, %v5631_v58  ;;  %v2735_v37 = vrot.slane %v2721_v8, %v5631_v58  ;;  %v4533_v31 = vpop.eup %4532 }
 0xdcd   : > { %v3042_v42 = vmul.f32 %v4531_v28, %v5912_v40  ;;  %v3043_v14 = vmul.f32 %v4533_v31, %v5914_v41 }
 0xdce   : > { %v2740_v39 = vcombine.low %v2712_v10, %v2719_v12  ;;  %v4079_v22 = vcombine.high %v2712_v10, %v2719_v12  ;;  %v2756_v6 = vcombine.low %v2728_v38, %v2735_v37  ;;  %v4080_v24 = vcombine.high %v2728_v38, %v2735_v37 }
 0xdcf   : > { %v3046_v50 = vpack.c.bf16 %v3042_v42, %v3042_v42  ;;  %v3047_v0 = vpack.c.bf16 %v3043_v14, %v3043_v14 }
 0xdd0   : > { %v2747_v15 = vrot.slane %v2740_v39, %v5620_v48  ;;  %v2755_v16 = vrot.slane %v4079_v22, %v5620_v48  ;;  %v2763_v17 = vrot.slane %v2756_v6, %v5620_v48  ;;  %v2771_v21 = vrot.slane %v4080_v24, %v5620_v48 }
 0xdd2   : > { %v2772_v19 = vcombine.low %v2747_v15, %v2755_v16  ;;  %v2773_v20 = vcombine.high %v2747_v15, %v2755_v16  ;;  %v2788_v23 = vcombine.low %v2763_v17, %v2771_v21  ;;  %v2789_v25 = vcombine.high %v2763_v17, %v2771_v21 }
 0xdd4   : > { %v2780_v26 = vrot.slane %v2772_v19, %v5631_v58  ;;  %v2787_v27 = vrot.slane %v2773_v20, %v5631_v58  ;;  %v2796_v29 = vrot.slane %v2788_v23, %v5631_v58  ;;  %v2803_v11 = vrot.slane %v2789_v25, %v5631_v58 }
 0xdd6   : > { %v2804_v32 = vcombine.low %v2780_v26, %v2796_v29  ;;  %v2805_v34 = vcombine.high %v2780_v26, %v2796_v29  ;;  %v2806_v13 = vcombine.low %v2787_v27, %v2803_v11  ;;  %v2807_v35 = vcombine.high %v2787_v27, %v2803_v11  ;;  %v4490_v26 = vld [vmem:[%s5521_s20 + $0x20] sm:$0xff]  }
 0xdd8   : > { %v2808_v55 = vpack.c.bf16 %v2804_v32, %v2804_v32  ;;  %v2809_v43 = vpack.c.bf16 %v2805_v34, %v2805_v34  ;;  %v2810_v1 = vpack.c.bf16 %v2806_v13, %v2806_v13  ;;  %v2811_v46 = vpack.c.bf16 %v2807_v35, %v2807_v35  ;;  %v4491_v35 = vld [vmem:[%s5521_s20 + $0x28] sm:$0xff]  }
 0xdda   : > { %v3054_v44 = vsel %vm1798_vm7, %v2808_v55, 0  ;;  %v3100_v45 = vsel %vm1798_vm7, %v2809_v43, 0  ;;  %v3146_v40 = vsel %vm1798_vm7, %v2810_v1, 0  ;;  %v3192_v41 = vsel %vm1798_vm7, %v2811_v46, 0 }
 0xddb   : > { %4279 = vmatpush3.bf16.msra.mxu0 %v3054_v44  ;;  %4285 = vmatpush3.bf16.msra.mxu1 %v3100_v45 }
 0xddc   : > { %4290 = vmatprep.subr.bf16.mxu0 %v4942_v9  ;;  %4296 = vmatprep.subr.bf16.mxu1 %v4942_v9 }
 0xdde   : > { %4281 = vmatmul.mubr.msk.bf16.vlgmr.msra.gmra.mrb[28].mxu0 %vm1562_vm5, %v3046_v50  ;;  %4287 = vmatmul.mubr.msk.bf16.vlgmr.msra.gmra.mrb[36].mxu1 %vm1562_vm5, %v3047_v0 }
 0xddf   : > { %4291 = vmatpush3.bf16.msra.mxu0 %v3146_v40  ;;  %4297 = vmatpush3.bf16.msra.mxu1 %v3192_v41 }
 0xde0   : > { %4292 = vmatprep.mubr.msk.bf16.mxu0 %vm4943_vm2, %v4942_v9  ;;  %4298 = vmatprep.mubr.msk.bf16.mxu1 %vm4943_vm2, %v4942_v9 }
 0xde1   : > { %4302 = vmatprep.subr.bf16.mxu0 %v4942_v9  ;;  %4310 = vmatprep.subr.bf16.mxu1 %v4942_v9 }
 0xdf5   : > { %v3037_v2 = vpop.xlane.xlu0 %3036 }
 0xdf6   : > { %4534 = vrcp.f32 %v3037_v2  ;;  %v3034_v51 = vpop.xlane.xlu1 %3033 }
 0xdf7   : > { %4536 = vrcp.f32 %v3034_v51 }
 0xe00   : > { %v4535_v52 = vpop.eup %4534 }
 0xe01   : > { %v4537_v53 = vpop.eup %4536  ;;  %v3045_v54 = vmul.f32 %v4535_v52, %v5924_v47 }
 0xe02   : > { %v3044_v59 = vmul.f32 %v4537_v53, %v5926_v49 }
 0xe03   : > { %v3049_v60 = vpack.c.bf16 %v3045_v54, %v3045_v54 }
 0xe04   : > { %v3048_v56 = vpack.c.bf16 %v3044_v59, %v3044_v59 }
 0xe05   : > { %4299 = vmatmul.mubr.msk.bf16.vlgmr.msra.gmra.mrb[40].mxu1 %vm1562_vm5, %v3049_v60 }
 0xe06   : > { %4293 = vmatmul.mubr.msk.bf16.vlgmr.msra.gmra.mrb[32].mxu0 %vm1562_vm5, %v3048_v56  ;;  %4314 = vmatprep.mubr.msk.bf16.mxu1 %vm4943_vm2, %v4942_v9 }
 0xe07   : > { %4306 = vmatprep.mubr.msk.bf16.mxu0 %vm4943_vm2, %v4942_v9  ;;  %4303 = vmatpush3.bf16.msra.mxu0 %v4490_v26 }
 0xe08   : > { %4304 = vmatprep.subr.bf16.mxu0 %v4942_v9 }
 0xe0b   : > { %4305 = vmatpush3.bf16.msra.mxu0 %v4491_v35 }
 0xe0c   : > { %4318 = vmatprep.subr.bf16.mxu0 %v4942_v9 }
 0xeb1   : > { %v3090_v57 = vpop.f32.mrb[28].mxu0  ;;  %v3136_v61 = vpop.f32.mrb[36].mxu1 }
 0xeb2   : > { %v4282_v62 = vpop.f32.mrb[29].mxu0  ;;  %v4288_v63 = vpop.f32.mrb[37].mxu1 }
 0xeb3   : > { %v3093_v3 = vpop.f32.mrb[30].mxu0  ;;  %v3139_v47 = vpop.f32.mrb[38].mxu1 }
 0xeb4   : > { %v4283_v4 = vpop.f32.mrb[31].mxu0  ;;  %v4289_v49 = vpop.f32.mrb[39].mxu1 }
 0xed8   : > { %v3228_v33 = vpop.f32.mrb[40].mxu1 }
 0xed9   : > { %v3182_v5 = vpop.f32.mrb[32].mxu0  ;;  %v3250_v7 = vcombine.low %v3136_v61, %v3228_v33  ;;  %v3251_v8 = vcombine.high %v3136_v61, %v3228_v33  ;;  %v4300_v10 = vpop.f32.mrb[41].mxu1  ;;  %v3449_v61 = vsub.s32 2, %v5573_v18 }
 0xeda   : > { %v3234_v12 = vcombine.low %v3090_v57, %v3182_v5  ;;  %v3235_v38 = vcombine.high %v3090_v57, %v3182_v5  ;;  %v4294_v37 = vpop.f32.mrb[33].mxu0  ;;  %v3231_v39 = vpop.f32.mrb[42].mxu1 }
 0xedb   : > { %v3258_v22 = vrot.slane %v3250_v7, %v5620_v48  ;;  %v3265_v6 = vrot.slane %v3251_v8, %v5620_v48  ;;  %v3185_v24 = vpop.f32.mrb[34].mxu0  ;;  %v4301_v15 = vpop.f32.mrb[43].mxu1  ;;  %v3450_v62 = vrot.slane %v5782_v30, %v3449_v61  ;;  %v4542_v8 = vld [vmem:[%s5545_s0] sm:$0x7]  ;;  %v4493_v39 = vld [vmem:[%s5498_s29 + $0x8] sm:$0xff]  }
 0xedc   : > { %v3242_v16 = vrot.slane %v3234_v12, %v5620_v48  ;;  %v3249_v17 = vrot.slane %v3235_v38, %v5620_v48  ;;  %v4295_v21 = vpop.f32.mrb[35].mxu0  ;;  %v3465_v10 = vrot.slane %v4542_v8, %v3449_v61  ;;  %v4492_v37 = vld [vmem:[%s5498_s29] sm:$0xff]  }
 0xedd   : > { %4311 = vmatpush3.bf16.msra.mxu1 %v4492_v37 }
 0xede   : > { %v3266_v19 = vcombine.low %v3242_v16, %v3258_v22  ;;  %v3267_v20 = vcombine.high %v3242_v16, %v3258_v22  ;;  %v3282_v23 = vcombine.low %v3249_v17, %v3265_v6  ;;  %v3283_v25 = vcombine.high %v3249_v17, %v3265_v6  ;;  %4312 = vmatprep.subr.bf16.mxu1 %v4942_v9  ;;  %v4494_v22 = vld [vmem:[%s5535_s16] sm:$0xff]   ;;  %v4495_v6 = vld [vmem:[%s5535_s16 + $0x8] sm:$0xff]  }
 0xee0   : > { %v3274_v27 = vrot.slane %v3266_v19, %v5631_v58  ;;  %v3281_v28 = vrot.slane %v3267_v20, %v5631_v58  ;;  %v3290_v29 = vrot.slane %v3282_v23, %v5631_v58  ;;  %v3297_v11 = vrot.slane %v3283_v25, %v5631_v58  ;;  %v4543_v25 = vld [vmem:[%s5551_s5] sm:$0x7] }
 0xee1   : > { %4313 = vmatpush3.bf16.msra.mxu1 %v4493_v39  ;;  %v3480_v26 = vrot.slane %v4543_v25, %v3449_v61 }
 0xee2   : > { %v3302_v31 = vcombine.low %v3274_v27, %v3281_v28  ;;  %v4089_v32 = vcombine.high %v3274_v27, %v3281_v28  ;;  %v3318_v34 = vcombine.low %v3290_v29, %v3297_v11  ;;  %v4090_v13 = vcombine.high %v3290_v29, %v3297_v11 }
 0xee4   : > { %v3309_v42 = vrot.slane %v3302_v31, %v5620_v48  ;;  %v3317_v14 = vrot.slane %v4089_v32, %v5620_v48  ;;  %v3325_v55 = vrot.slane %v3318_v34, %v5620_v48  ;;  %v3333_v43 = vrot.slane %v4090_v13, %v5620_v48  ;;  %v4496_v31 = vld [vmem:[%s5535_s16 + $0x10] sm:$0xff]   ;;  %v4497_v32 = vld [vmem:[%s5535_s16 + $0x18] sm:$0xff]   ;;  %v4098_v34 = vld [vmem:[%s972_s8] ss:$0 sm:$0xff]  ;;  %s6263_s16 = sld [smem:[#allocation30_spill]] }
 0xee6   : > { %v3335_v44 = vcombine.high %v3309_v42, %v3317_v14  ;;  %v3351_v45 = vcombine.high %v3325_v55, %v3333_v43  ;;  %v3334_v1 = vcombine.low %v3309_v42, %v3317_v14  ;;  %v3350_v46 = vcombine.low %v3325_v55, %v3333_v43 }
 0xee8   : > { %v3349_v50 = vrot.slane %v3335_v44, %v5631_v58  ;;  %v3365_v0 = vrot.slane %v3351_v45, %v5631_v58  ;;  %v3342_v40 = vrot.slane %v3334_v1, %v5631_v58  ;;  %v3358_v41 = vrot.slane %v3350_v46, %v5631_v58 }
 0xeea   : > { %v3368_v2 = vcombine.low %v3349_v50, %v3365_v0  ;;  %v3367_v51 = vcombine.high %v3342_v40, %v3358_v41  ;;  %v3369_v52 = vcombine.high %v3349_v50, %v3365_v0  ;;  %v3366_v53 = vcombine.low %v3342_v40, %v3358_v41  ;;  %p4108_p9 = scmp.ne.s32.totalorder %s6263_s16, 1 }
 0xeeb   : > { %s6264_s8 = sld [smem:[#allocation60_spill]] (!%p4108_p9)  ;;  %s6265_s21 = sld [smem:[#allocation61_spill]] (!%p4108_p9) }
 0xeec   : > { %3375 = vrot.lane.b32.xlu1 %v3368_v2, %s4951_s28  ;;  %3371 = vrot.lane.b32.xlu0 %v3367_v51, %s4952_s27 }
 0xef0   : > { %3379 = vrot.lane.b32.xlu1 %v3369_v52, %s4953_s18 }
 0xf5e   : > { %v3376_v48 = vpop.permute.xlu1 %3375  ;;  %v3372_v54 = vpop.permute.xlu0 %3371 }
 0xf5f   : > { %v3382_v59 = vsel %vm1562_vm5, %v3366_v53, %v3372_v54 }
 0xf60   : > { %v3383_v56 = vsel %vm2129_vm8, %v3382_v59, %v3376_v48 }
 0xf62   : > { %v3380_v60 = vpop.permute.xlu1 %3379 }
 0xf63   : > { %v3384_v58 = vsel %vm2131_vm9, %v3383_v56, %v3380_v60 }
 0xf64   : > { %v3385_v57 = vpack.c.bf16 %v3384_v58, %v3384_v58 }
 0xf66   : > { %4307 = vmatmul.mubr.msk.bf16.vlgmr.msra.gmra.mrb[36].mxu0 %vm1009_vm1, %v3385_v57 }
 0xf67   : > { %4326 = vmatprep.mubr.msk.bf16.mxu0 %vm4943_vm2, %v4942_v9  ;;  %4319 = vmatpush3.bf16.msra.mxu0 %v4494_v22 }
 0xf68   : > { %4320 = vmatprep.subr.bf16.mxu0 %v4942_v9 }
 0xf6b   : > { %4321 = vmatpush3.bf16.msra.mxu0 %v4495_v6 }
 0xf6c   : > { %4322 = vmatprep.subr.bf16.mxu0 %v4942_v9 }
 0xf6f   : > { %4323 = vmatpush3.bf16.msra.mxu0 %v4496_v31 }
 0xf70   : > { %4324 = vmatprep.subr.bf16.mxu0 %v4942_v9  ;;  %v4107_v9 = vld [vmem:[%s980_s22] ss:$0 sm:$0xff] }
 0xf73   : > { %4325 = vmatpush3.bf16.msra.mxu0 %v4497_v32 }
0x1039   : > { %v3440_v63 = vpop.f32.mrb[36].mxu0 }
0x103a   : > { %v3446_v3 = vadd.f32 %v3440_v63, %v5787_v36  ;;  %v4308_v47 = vpop.f32.mrb[37].mxu0  ;;  %v4109_v63 = vld [vmem:[%s6264_s8] ss:$0 sm:$0xff] (!%p4108_p9) }
0x103b   : > { %v3443_v4 = vpop.f32.mrb[38].mxu0 }
0x103c   : > { %v3451_v49 = vadd.f32 %v3450_v62, %v3446_v3  ;;  %v4309_v33 = vpop.f32.mrb[39].mxu0  ;;  %v4110_v4 = vld [vmem:[%s6265_s21] ss:$0 sm:$0xff] (!%p4108_p9) }
0x103e   : > { %v3452_v5 = vsel %vm1009_vm1, %v3451_v49, 0.0 }
0x103f   : > { %3453 = vadd.xlane.f32.xlu0 %v3452_v5 }
0x10cc   : > { %v3454_v7 = vpop.xlane.xlu0 %3453 }
0x10cd   : > { %v3455_v18 = vmul.f32 0.03125, %v3454_v7 }
0x10cf   : > { %v3456_v12 = vsub.f32 %v3451_v49, %v3455_v18 }
0x10d1   : > { %v3466_v30 = vmul.f32 %v3465_v10, %v3456_v12  ;;  %v3457_v38 = vmul.f32 %v3456_v12, %v3456_v12 }
0x10d3   : > { %v3458_v36 = vsel %vm1009_vm1, %v3457_v38, 0.0 }
0x10d4   : > { %3459 = vadd.xlane.f32.xlu1 %v3458_v36 }
0x1161   : > { %v3460_v24 = vpop.xlane.xlu1 %3459 }
0x1162   : > { %v3461_v15 = vmul.f32 0.032258064, %v3460_v24 }
0x1164   : > { %4538 = vrsqrt.f32 %v3461_v15  ;;  %vm3469_vm13 = vcmp.eq.f32.partialorder %v3461_v15, inf  ;;  %v3472_v21 = vand.u32 2147483648, %v3461_v15  ;;  %vm3471_vm14 = vcmp.eq.f32.partialorder %v3461_v15, 0.0 }
0x116e   : > { %v4539_v16 = vpop.eup %4538 }
0x116f   : > { %v3468_v17 = vmul.f32 %v4539_v16, %v3461_v15 }
0x1171   : > { %v3470_v19 = vsel %vm3469_vm13, %v3461_v15, %v3468_v17 }
0x1172   : > { %v3473_v20 = vsel %vm3471_vm14, %v3472_v21, %v3470_v19 }
0x1173   : > { %v3474_v23 = vadd.f32 1e-06, %v3473_v20 }
0x1175   : > { %4540 = vrcp.f32 %v3474_v23 }
0x117f   : > { %v4541_v27 = vpop.eup %4540 }
0x1180   : > { %v3476_v28 = vmul.f32 %v4541_v27, %v3466_v30 }
0x1182   : > { %v3481_v29 = vadd.f32 %v3480_v26, %v3476_v28 }
0x1184   : > { %v3482_v11 = vpack.c.bf16 %v3481_v29, %v3481_v29 }
0x1186   : > { %4315 = vmatmul.mubr.msk.bf16.vlgmr.msra.gmra.mrb[44].mxu1 %vm1009_vm1, %v3482_v11 }
0x1259   : > { %v3543_v13 = vpop.f32.mrb[44].mxu1 }
0x125a   : > { %v3544_v35 = vadd.f32 %v4098_v34, %v3543_v13  ;;  %v4316_v42 = vpop.f32.mrb[45].mxu1 }
0x125b   : > { %v3546_v14 = vpop.f32.mrb[46].mxu1 }
0x125c   : > { %v3549_v55 = vmax.f32 %v3544_v35, 0.0  ;;  %v4317_v43 = vpop.f32.mrb[47].mxu1 }
0x125e   : > { %v3550_v44 = vpack.c.bf16 %v3549_v55, %v3549_v55 }
0x1260   : > { %4327 = vmatmul.mubr.msk.bf16.vlgmr.msra.gmra.mrb[40].mxu0 %vm3583_vm15, %v3550_v44 }
0x1332   : > { %3640 = sbr.rel (%p4108_p9) target bundleno = 5247 (0x147f), region = 132 }
0x1333   : > { %v3621_v45 = vpop.f32.mrb[40].mxu0 }
0x1334   : > { %v3627_v1 = vadd.f32 %v3621_v45, %v3451_v49  ;;  %v4328_v46 = vpop.f32.mrb[41].mxu0 }
0x1335   : > { %v3624_v50 = vpop.f32.mrb[42].mxu0 }
0x1336   : > { %v3635_v0 = vadd.f32 %v4107_v9, %v3627_v1  ;;  %v4329_v40 = vpop.f32.mrb[43].mxu0 }
0x1338   : > { %3636 = vst.msk [vmem:[#allocation2] sm:$0xff] %vm1009_vm1, %v3635_v0  ;;  %v3643_v41 = vsel (!%p4108_p9), %vm1009_vm1, %v3635_v0, 0.0 }
0x1339   : > { %3644 = vadd.xlane.f32.xlu0 %v3643_v41 }
0x13c6   : > { %v3645_v2 = vpop.xlane.xlu0 %3644 }
0x13c7   : > { %v3646_v51 = vmul.f32 0.03125, %v3645_v2 }
0x13c9   : > { %v3647_v52 = vsub.f32 %v3635_v0, %v3646_v51 }
0x13cb   : > { %v3648_v53 = vmul.f32 %v3647_v52, %v3647_v52  ;;  %v3659_v3 = vmul.f32 %v4109_v63, %v3647_v52 }
0x13cd   : > { %v3649_v48 = vsel %vm1009_vm1, %v3648_v53, 0.0 }
0x13ce   : > { %3650 = vadd.xlane.f32.xlu0 %v3649_v48 }
0x145b   : > { %v3651_v54 = vpop.xlane.xlu0 %3650 }
0x145c   : > { %v3652_v59 = vmul.f32 0.032258064, %v3651_v54 }
0x145e   : > { %4544 = vrsqrt.f32 %v3652_v59  ;;  %vm3662_vm0 = vcmp.eq.f32.partialorder %v3652_v59, inf  ;;  %v3665_v58 = vand.u32 2147483648, %v3652_v59  ;;  %vm3664_vm2 = vcmp.eq.f32.partialorder %v3652_v59, 0.0 }
0x1468   : > { %v4545_v60 = vpop.eup %4544 }
0x1469   : > { %v3661_v56 = vmul.f32 %v4545_v60, %v3652_v59 }
0x146b   : > { %v3663_v57 = vsel %vm3662_vm0, %v3652_v59, %v3661_v56 }
0x146c   : > { %v3666_v61 = vsel %vm3664_vm2, %v3665_v58, %v3663_v57 }
0x146d   : > { %v3667_v62 = vadd.f32 1e-06, %v3666_v61 }
0x146f   : > { %4546 = vrcp.f32 %v3667_v62 }
0x1479   : > { %v4547_v47 = vpop.eup %4546 }
0x147a   : > { %v3669_v49 = vmul.f32 %v4547_v47, %v3659_v3 }
0x147c   : > { %v3676_v33 = vadd.f32 %v4110_v4, %v3669_v49 }
0x147e   : > { %3677 = vst.msk [vmem:[%s955_s7] sm:$0xff] %vm1009_vm1, %v3676_v33 }
0x147f PF: > { %s6266_s23 = sld [smem:[#allocation31_spill]]  ;;  %s6267_s13 = sld [smem:[#allocation38_spill]] }
0x1480   : > { %s6268_s25 = sld [smem:[#allocation62_spill]]  ;;  %s3692_s27 = sshll.u32 %s955_s7, 4  ;;  %s3693_s27 = int_to_ptr.vmem [resolvable:$true] %s3692_s27 }
0x1481   : > { %s3679_s18 = scalar_lea.sflag [#allocation5], %s5458_s3  ;;  %s4788_s12 = scalar_lea.vmem %s3693_s27, 128 }
0x1482   : > { %p4789_p10 = scmp.ne.s32.totalorder %s3693_s27, %s4788_s12  ;;  %s4954_s15 = smov [#allocation17]  }
0x1483   : > { %s4792_s26 = sshll.u32 %s4954_s15, 4  ;;  %s4793_s26 = int_to_ptr.vmem [resolvable:$false] %s4792_s26 }
0x1484   : > { %s4794_s24 = scalar_lea.vmem %s4793_s26, 256  ;;  %p4795_p12 = scmp.lt.s32.totalorder %s3693_s27, %s4793_s26 }
0x1485   : > { %s4112_s1 = sshll.u32 %s6266_s23, 7  ;;  %p6269_p2 = scmp.ne.s32.totalorder %s6267_s13, 0 }
0x1486   : > { %s6046_s28 = scalar_lea.hbm %s6268_s25, %s4112_s1  ;;  %p4796_p5 = scmp.lt.s32.totalorder %s4794_s24, %s4788_s12 }
0x1487   : > { %p4790_p3 = pnand %p4789_p10, %p6269_p2 }
0x1488   : > { %p4797_p0 = por %p4796_p5, %p4795_p12 }
0x1489   : > { %p4791_p1 = pneg %p4790_p3 }
0x148b   : > { %p4798_p4 = pnand %p4797_p0, %p4791_p1 }
0x148d   : > { %4801 = shalt.err (!%p4798_p4)
}
0x148e   : > { %s4802_s3 = scalar_lea.hbm %s6046_s28, 128  ;;  %s4806_s14 = scalar_lea.hbm %s6268_s25, 256 }
0x148f   : > { %p4803_p11 = scmp.ne.s32.totalorder %s6046_s28, %s4802_s3  ;;  %p4807_p13 = scmp.lt.u32.totalorder %s6046_s28, %s6268_s25 }
0x1490   : > { %p4808_p7 = scmp.lt.u32.totalorder %s4806_s14, %s4802_s3  ;;  %p4810_p10 = scmp.lt.u32.totalorder %s4802_s3, %s6046_s28 }
0x1491   : > { %p4804_p6 = pnand %p4803_p11, %p6269_p2 }
0x1492   : > { %p4809_p9 = por %p4808_p7, %p4807_p13 }
0x1493   : > { %p4805_p8 = pneg %p4804_p6 }
0x1494   : > { %p4811_p3 = por %p4810_p10, %p4809_p9 }
0x1496   : > { %p4812_p1 = pnand %p4811_p3, %p4805_p8 }
0x1498   : > { %4815 = shalt.err (!%p4812_p1)
}
0x1499   : > { %4347 = dma.vmem_to_hbm [thread:$0]  (%p6269_p2), %s3693_s27, 128, %s6046_s28, %s3679_s18  }
0x149a PF: > { %s6270_s20 = sld [smem:[#allocation34_spill]]  ;;  %s6271_s29 = sld [smem:[#allocation27_spill]] }
0x149b   : > { %s6272_s6 = sld [smem:[#allocation39_spill]] }
0x14a0   : > { %p4379_p12 = scmp.ge.s32.totalorder %s6270_s20, 2  ;;  %s3704_s2 = sand.u32 1, %s6271_s29  }
0x14a1   : > { %p6273_p5 = scmp.ne.s32.totalorder %s6272_s6, 0  ;;  %s3705_s11 = scalar_lea.sflag [#allocation5], %s3704_s2 }
0x14a3   : > { %p4375_p0 = pnand %p4379_p12, %p6273_p5 }
0x14a5   : > { %4885 = dma.done.wait (!%p4375_p0), %s3705_s11, 128  }
0x14a6   : > { %4887 = vsyncadd (!%p4375_p0), %s3705_s11, 4294967168  ;;  %s46_s2 = sadd.s32 1, %s6270_s20   ;;  %s6274_s27 = sld [smem:[#allocation25_spill]] }
0x14a7   : > { %p43_p4 = scmp.ge.s32.totalorder %s46_s2, 6   ;;  %s6275_s28 = sld [smem:[#allocation26_spill]] }
0x14a8   : > { %s6276_s29 = sld [smem:[#allocation42_spill]]  ;;  %s6277_s30 = sld [smem:[#allocation28_spill]] }
0x14a9   : > { %s6278_s0 = sld [smem:[#allocation29_spill]]  ;;  %s6279_s19 = sld [smem:[#allocation43_spill]] }
0x14aa   : > { %s6280_s1 = sld [smem:[#allocation32_spill]]  ;;  %s6281_s20 = sld [smem:[#allocation33_spill]] }
0x14ab   : > { %s6282_s21 = sld [smem:[#allocation40_spill]]  ;;  %s6283_s22 = sld [smem:[#allocation41_spill]] }
0x14ac   :  { %45 = sbr.rel (!%p43_p4) target bundleno = 37 (0x25), region = 256 }
0x14b3   :  { %3710 = vsyncpa [#allocation4], 1 }
0x14b4   :  { %3712 = vsyncpa [#allocation4 + $0x1], 1 }
0x14b5   :  { %3713 = vsyncpa [#allocation7], 1 }
0x14b6   :  { %3715 = vsyncpa [#allocation7 + $0x1], 1 }
0x14b7   :  { %3716 = vsyncpa [#allocation10], 1 }
0x14b8   :  { %3718 = vsyncpa [#allocation10 + $0x1], 1 }
0x14b9   :  { %3719 = vsyncpa [#allocation13], 1 }
0x14ba   :  { %3721 = vsyncpa [#allocation13 + $0x1], 1 }
0x14bb   :  { %3722 = vsyncpa [#allocation16], 1 }
0x14bc   :  { %3724 = vsyncpa [#allocation16 + $0x1], 1 }
0x14bd   :  { %3725 = vsyncpa [#allocation5], 1 }
0x14be   :  { %3727 = vsyncpa [#allocation5 + $0x1], 1 }

</bundles_post_ra>
